<compile_context>
chip_gen: v5e
topology: v5e:2x2
jax: 0.10.0
libtpu: 0.0.40
codegen_flags: <defaults>
</compile_context>

<pallas_src>
import functools

import jax
import jax.numpy as jnp
from jax import lax
from jax.experimental import pallas as pl
from jax.experimental.pallas import tpu as pltpu

NEG_SLOPE = 0.2
_ROW_TILE = 256   # row tile for the fused linear kernels (multiple of 8)


def _leaky(y):
    return jnp.where(y >= 0, y, NEG_SLOPE * y)


# ---------------------------------------------------------------------------
# K1: encoder Linear + softmax + gram + row-sum  (whole batch, one invocation)
# ---------------------------------------------------------------------------
def _encode_gram_kernel(t_ref, w_ref, b_ref, m_ref, rs_ref, *, bz, R):
    x = jnp.dot(t_ref[...], w_ref[...],
                preferred_element_type=jnp.float32) + b_ref[...]
    # row softmax in f32
    x = x - jnp.max(x, axis=-1, keepdims=True)
    e = jnp.exp(x)
    p = e / jnp.sum(e, axis=-1, keepdims=True)
    # Per-batch gram; bz is small & static -> unrolled inside ONE kernel call
    # (one pallas_call, no per-grid-step launch overhead).
    for b in range(bz):
        pb = p[b * R:(b + 1) * R, :]
        # Contraction on the embed axis of BOTH operands: the "transpose" is
        # consumed by the MXU and never materialized through the XLU.
        mb = lax.dot_general(pb, pb,
                             dimension_numbers=(((1,), (1,)), ((), ())),
                             preferred_element_type=jnp.float32)
        m_ref[b] = mb
        # row-sum of the gram, emitted while m is still in VMEM
        rs_ref[pl.ds(b * R, R), :] = jnp.sum(mb, axis=-1, keepdims=True)


def encode_softmax_gram(t2, enc_w, enc_b, bz, R):
    rows, T = t2.shape
    E = enc_w.shape[1]
    kern = functools.partial(_encode_gram_kernel, bz=bz, R=R)
    return pl.pallas_call(
        kern,
        out_shape=(jax.ShapeDtypeStruct((bz, R, R), jnp.float32),
                   jax.ShapeDtypeStruct((rows, 1), jnp.float32)),
        grid=(1,),
        in_specs=[pl.BlockSpec((rows, T), lambda i: (0, 0)),
                  pl.BlockSpec((T, E), lambda i: (0, 0)),
                  pl.BlockSpec((1, E), lambda i: (0, 0))],
        out_specs=[pl.BlockSpec((bz, R, R), lambda i: (0, 0, 0)),
                   pl.BlockSpec((rows, 1), lambda i: (0, 0))],
    )(t2, enc_w, enc_b.reshape(1, E))


# ---------------------------------------------------------------------------
# K2-K5: row-tiled fused linear-chain kernels
# ---------------------------------------------------------------------------
def _block1_kernel(ps_ref, nd_ref, rs_ref, fw_ref, fb_ref,
                   w0_ref, b0_ref, w1_ref, b1_ref, o_ref):
    # fc_p + LeakyReLU, fused with the `nodes + pseudo` add
    ps = _leaky(jnp.dot(ps_ref[...], fw_ref[...],
                        preferred_element_type=jnp.float32) + fb_ref[...])
    node = nd_ref[...] + ps
    # einsum('ijk,ijp->ijp', m, node) == rowsum(m) * node  (per-row scalar)
    h = rs_ref[...] * node
    h = _leaky(jnp.dot(h, w0_ref[...],
                       preferred_element_type=jnp.float32) + b0_ref[...])
    o_ref[...] = jnp.dot(h, w1_ref[...],
                         preferred_element_type=jnp.float32) + b1_ref[...]


def _block2_kernel(x_ref, sc_ref, sh_ref, rs_ref, w_ref, b_ref, o_ref):
    xn = x_ref[...] * sc_ref[...] + sh_ref[...]     # BN1 applied as scale/shift
    h = rs_ref[...] * xn
    o_ref[...] = _leaky(jnp.dot(h, w_ref[...],
                                preferred_element_type=jnp.float32) + b_ref[...])


def _block3_kernel(x_ref, sc_ref, sh_ref, rs_ref,
                   w0_ref, b0_ref, w1_ref, b1_ref, o_ref):
    xn = x_ref[...] * sc_ref[...] + sh_ref[...]     # BN2 applied as scale/shift
    h = rs_ref[...] * xn
    h = _leaky(jnp.dot(h, w0_ref[...],
                       preferred_element_type=jnp.float32) + b0_ref[...])
    o_ref[...] = _leaky(jnp.dot(h, w1_ref[...],
                                preferred_element_type=jnp.float32) + b1_ref[...])


def _mlp3_kernel(x_ref, w0_ref, b0_ref, w1_ref, b1_ref, w2_ref, b2_ref, o_ref):
    h = _leaky(jnp.dot(x_ref[...], w0_ref[...],
                       preferred_element_type=jnp.float32) + b0_ref[...])
    h = _leaky(jnp.dot(h, w1_ref[...],
                       preferred_element_type=jnp.float32) + b1_ref[...])
    o_ref[...] = jnp.dot(h, w2_ref[...],
                         preferred_element_type=jnp.float32) + b2_ref[...]


def _row_fused_call(kernel, inputs, tiled, rows, dout):
    """Tile the `rows` axis across the grid; broadcast everything else."""
    tm = rows if rows <= _ROW_TILE else _ROW_TILE
    in_specs = []
    for a, is_tiled in zip(inputs, tiled):
        c = a.shape[1]
        if is_tiled:
            in_specs.append(pl.BlockSpec((tm, c), lambda i: (i, 0)))
        else:
            in_specs.append(pl.BlockSpec((a.shape[0], c), lambda i: (0, 0)))
    return pl.pallas_call(
        kernel,
        out_shape=jax.ShapeDtypeStruct((rows, dout), jnp.float32),
        grid=(pl.cdiv(rows, tm),),
        in_specs=in_specs,
        out_specs=pl.BlockSpec((tm, dout), lambda i: (i, 0)),
        compiler_params=pltpu.CompilerParams(
            dimension_semantics=("parallel",)),
    )(*inputs)


# ---------------------------------------------------------------------------
# Plain-JAX glue (global / data-dependent)
# ---------------------------------------------------------------------------
def _bn_scale_shift(x2d, gamma, beta, eps=1e-5):
    # PyTorch BatchNorm1d on (N, C), training mode (batch stats, biased var),
    # folded into y = x * scale + shift so it can be applied in the next kernel.
    mean = jnp.mean(x2d, axis=0)
    var = jnp.mean(jnp.square(x2d - mean), axis=0)
    scale = gamma / jnp.sqrt(var + eps)
    shift = beta - mean * scale
    return scale.reshape(1, -1), shift.reshape(1, -1)


def batchnorm1d_3d(x, gamma, beta, eps=1e-5):
    # PyTorch BatchNorm1d on (N, C, L): normalize over (N, L) per channel C
    mean = jnp.mean(x, axis=(0, 2), keepdims=True)
    var = jnp.mean(jnp.square(x - mean), axis=(0, 2), keepdims=True)
    return (x - mean) / jnp.sqrt(var + eps) * gamma[None, :, None] + beta[None, :, None]


# ---------------------------------------------------------------------------
# Model
# ---------------------------------------------------------------------------
def plsnet_forward(params, t, nodes, pseudo, roi_num):
    bz = t.shape[0]
    R = roi_num
    rows = bz * R
    D = nodes.shape[-1]

    # Encoder + softmax + Embed2GraphByProduct + gram row-sum, fused (K1).
    # TODO(synk): the original `Encoder` class is not in the source; approximated
    # as a deterministic per-ROI Linear(time_series -> embed_dim).
    m, rs = encode_softmax_gram(t.reshape(rows, -1),
                                params["enc_w"], params["enc_b"], bz, R)

    # edge variance: mean over batch of per-sample unbiased variance
    edge_variance = jnp.mean(jnp.var(m.reshape(bz, -1), axis=1, ddof=1))

    # ---- GCN block 1: fc_p + nodes add + row-scale + gcn (2 linears) ----
    x1 = _row_fused_call(
        _block1_kernel,
        [pseudo.reshape(rows, R), nodes.reshape(rows, D), rs,
         params["fcp_w"], params["fcp_b"].reshape(1, -1),
         params["gcn_w0"], params["gcn_b0"].reshape(1, -1),
         params["gcn_w1"], params["gcn_b1"].reshape(1, -1)],
        [True, True, True, False, False, False, False, False, False],
        rows, R)

    # ---- GCN block 2: BN1 + row-scale + gcn1 ----
    sc1, sh1 = _bn_scale_shift(x1, params["bn1_g"], params["bn1_b"])
    x2 = _row_fused_call(
        _block2_kernel,
        [x1, sc1, sh1, rs, params["gcn1_w"], params["gcn1_b"].reshape(1, -1)],
        [True, False, False, True, False, False],
        rows, R)

    # ---- GCN block 3: BN2 + row-scale + gcn2 (2 linears) ----
    sc2, sh2 = _bn_scale_shift(x2, params["bn2_g"], params["bn2_b"])
    x3 = _row_fused_call(
        _block3_kernel,
        [x2, sc2, sh2, rs,
         params["gcn2_w0"], params["gcn2_b0"].reshape(1, -1),
         params["gcn2_w1"], params["gcn2_b1"].reshape(1, -1)],
        [True, False, False, True, False, False, False, False],
        rows, 8)

    x = batchnorm1d_3d(x3.reshape(bz, R, 8), params["bn3_g"], params["bn3_b"])

    # node scoring + rank-based selection (matches the reference double-argsort gather)
    score = jax.nn.sigmoid(jnp.sum(x * params["score_w"], axis=-1))   # (bz, R)
    sc = score
    idx = jnp.argsort(score, axis=-1)
    rank = jnp.argsort(idx, axis=-1)
    l = int(R * 0.7)
    sel = rank[:, :l]                                                  # (bz, l)
    x_p = jnp.take_along_axis(x, sel[:, :, None], axis=1)              # (bz, l, 8)
    xflat = x_p.reshape(bz, -1)

    # ---- final MLP: 3 linears fused in one kernel (K5) ----
    logits = _row_fused_call(
        _mlp3_kernel,
        [xflat,
         params["fcn_w0"], params["fcn_b0"].reshape(1, -1),
         params["fcn_w1"], params["fcn_b1"].reshape(1, -1),
         params["fcn_w2"], params["fcn_b2"].reshape(1, -1)],
        [True, False, False, False, False, False, False],
        bz, 2)

    return (logits, sc), m, edge_variance


# ---------------------------------------------------------------------------
# Deterministic parameter init
# ---------------------------------------------------------------------------
def init_params(key, roi_num, node_feature_dim, time_series, embed_dim):
    R, D, T, E = roi_num, node_feature_dim, time_series, embed_dim
    l = int(R * 0.7)
    shapes = {
        "enc_w": (T, E), "enc_b": (E,),
        "fcp_w": (R, R), "fcp_b": (R,),
        "gcn_w0": (D, R), "gcn_b0": (R,),
        "gcn_w1": (R, R), "gcn_b1": (R,),
        "gcn1_w": (R, R), "gcn1_b": (R,),
        "gcn2_w0": (R, 64), "gcn2_b0": (64,),
        "gcn2_w1": (64, 8), "gcn2_b1": (8,),
        "score_w": (1, 8),
        "fcn_w0": (8 * l, 256), "fcn_b0": (256,),
        "fcn_w1": (256, 32), "fcn_b1": (32,),
        "fcn_w2": (32, 2), "fcn_b2": (2,),
    }
    params = {}
    keys = jax.random.split(key, len(shapes))
    for k, (name, shp) in zip(keys, sorted(shapes.items())):
        if name.endswith("_b"):
            params[name] = jnp.zeros(shp, jnp.float32)
        else:
            params[name] = 0.1 * jax.random.normal(k, shp, jnp.float32)
    for n in ("bn1", "bn2", "bn3"):
        params[f"{n}_g"] = jnp.ones((R,), jnp.float32)
        params[f"{n}_b"] = jnp.zeros((R,), jnp.float32)
    return params


# ---------------------------------------------------------------------------
if __name__ == "__main__":
    bz = 2
    roi_num = 16            # roi_num == node_feature_dim (as in the 360/360 default)
    node_feature_dim = 16
    time_series = 32
    embed_dim = 24

    key = jax.random.PRNGKey(0)
    k_t, k_n, k_p, k_w = jax.random.split(key, 4)
    t = jax.random.normal(k_t, (bz, roi_num, time_series), jnp.float32)
    nodes = jax.random.normal(k_n, (bz, roi_num, node_feature_dim), jnp.float32)
    pseudo = jax.random.normal(k_p, (bz, roi_num, roi_num), jnp.float32)

    params = init_params(k_w, roi_num, node_feature_dim, time_series, embed_dim)

    fwd = jax.jit(functools.partial(plsnet_forward, roi_num=roi_num))
    (logits, score), m, edge_variance = fwd(params, t, nodes, pseudo)
    jax.block_until_ready((logits, score, m, edge_variance))

    assert logits.shape == (bz, 2)
    assert score.shape == (bz, roi_num)
    assert m.shape == (bz, roi_num, roi_num)
    assert edge_variance.shape == ()
    assert bool(jnp.all(jnp.isfinite(logits)))
    print("KERNEL_OK")
</pallas_src>

<mosaic_0001>
module attributes {stable_mosaic.version = 11 : i64} {
  func.func @_encode_gram_kernel(%arg0: i32, %arg1: memref<32x32xf32, #tpu.memory_space<vmem>>, %arg2: memref<32x24xf32, #tpu.memory_space<vmem>>, %arg3: memref<1x24xf32, #tpu.memory_space<vmem>>, %arg4: memref<2x16x16xf32, #tpu.memory_space<vmem>>, %arg5: memref<32x1xf32, #tpu.memory_space<vmem>>) attributes {dimension_semantics = [#tpu.dimension_semantics<arbitrary>], iteration_bounds = array<i64: 1>, scalar_prefetch = 0 : i64, scratch_operands = 0 : i64, tpu.core_type = #tpu.core_type<tc>, window_params = [{pipeline_mode = #tpu.pipeline_mode<synchronous>, transform_indices = @transform_0, window_bounds = array<i64: 32, 32>}, {pipeline_mode = #tpu.pipeline_mode<synchronous>, transform_indices = @transform_1, window_bounds = array<i64: 32, 24>}, {pipeline_mode = #tpu.pipeline_mode<synchronous>, transform_indices = @transform_2, window_bounds = array<i64: 1, 24>}, {pipeline_mode = #tpu.pipeline_mode<synchronous>, transform_indices = @transform_3, window_bounds = array<i64: 2, 16, 16>}, {pipeline_mode = #tpu.pipeline_mode<synchronous>, transform_indices = @transform_4, window_bounds = array<i64: 32, 1>}]} {
    %c0 = arith.constant 0 : index
    %c0_0 = arith.constant 0 : index
    %0 = vector.load %arg1[%c0, %c0_0] : memref<32x32xf32, #tpu.memory_space<vmem>>, vector<32x32xf32>
    %c0_1 = arith.constant 0 : index
    %c0_2 = arith.constant 0 : index
    %1 = vector.load %arg2[%c0_1, %c0_2] : memref<32x24xf32, #tpu.memory_space<vmem>>, vector<32x24xf32>
    %cst = arith.constant dense<0.000000e+00> : vector<32x24xf32>
    %2 = tpu.matmul %0, %1, %cst {dimension_numbers = #tpu.dot_dimension_numbers<[1], [0], [0], [1], [0, 0, 1, 1], [], []>} : vector<32x32xf32>, vector<32x24xf32>, vector<32x24xf32> -> vector<32x24xf32>
    %c0_3 = arith.constant 0 : index
    %c0_4 = arith.constant 0 : index
    %3 = vector.load %arg3[%c0_3, %c0_4] : memref<1x24xf32, #tpu.memory_space<vmem>>, vector<1x24xf32>
    %4 = vector.broadcast %3 : vector<1x24xf32> to vector<32x24xf32>
    %5 = arith.addf %2, %4 : vector<32x24xf32>
    %cst_5 = arith.constant dense<0xFF800000> : vector<32xf32>
    %6 = vector.multi_reduction <maximumf>, %5, %cst_5 [1] : vector<32x24xf32> to vector<32xf32>
    %7 = vector.shape_cast %6 : vector<32xf32> to vector<32x1xf32>
    %8 = vector.broadcast %7 : vector<32x1xf32> to vector<32x24xf32>
    %9 = arith.subf %5, %8 : vector<32x24xf32>
    %10 = math.exp %9 : vector<32x24xf32>
    %cst_6 = arith.constant dense<0.000000e+00> : vector<32xf32>
    %11 = vector.multi_reduction <add>, %10, %cst_6 [1] : vector<32x24xf32> to vector<32xf32>
    %12 = vector.shape_cast %11 : vector<32xf32> to vector<32x1xf32>
    %13 = vector.broadcast %12 : vector<32x1xf32> to vector<32x24xf32>
    %14 = arith.divf %10, %13 : vector<32x24xf32>
    %15 = vector.extract_strided_slice %14 {offsets = [0, 0], sizes = [16, 24], strides = [1, 1]} : vector<32x24xf32> to vector<16x24xf32>
    %cst_7 = arith.constant dense<0.000000e+00> : vector<16x16xf32>
    %16 = tpu.matmul %15, %15, %cst_7 {dimension_numbers = #tpu.dot_dimension_numbers<[1], [1], [0], [0], [0, 0, 1, 0], [], []>} : vector<16x24xf32>, vector<16x24xf32>, vector<16x16xf32> -> vector<16x16xf32>
    %c0_8 = arith.constant 0 : index
    %c0_9 = arith.constant 0 : index
    %c0_10 = arith.constant 0 : index
    %17 = vector.load %arg4[%c0_8, %c0_9, %c0_10] : memref<2x16x16xf32, #tpu.memory_space<vmem>>, vector<1x16x16xf32>
    %18 = vector.shape_cast %17 : vector<1x16x16xf32> to vector<16x16xf32>
    %19 = vector.shape_cast %16 : vector<16x16xf32> to vector<1x16x16xf32>
    tpu.vector_store %arg4[%c0_8, %c0_9, %c0_10], %19 {strides = array<i32>} : memref<2x16x16xf32, #tpu.memory_space<vmem>>, vector<1x16x16xf32>,
    %cst_11 = arith.constant dense<0.000000e+00> : vector<16xf32>
    %20 = vector.multi_reduction <add>, %16, %cst_11 [1] : vector<16x16xf32> to vector<16xf32>
    %21 = vector.shape_cast %20 : vector<16xf32> to vector<16x1xf32>
    %c0_12 = arith.constant 0 : index
    %c0_13 = arith.constant 0 : index
    %22 = vector.load %arg5[%c0_12, %c0_13] : memref<32x1xf32, #tpu.memory_space<vmem>>, vector<16x1xf32>
    tpu.vector_store %arg5[%c0_12, %c0_13], %21 {strides = array<i32>} : memref<32x1xf32, #tpu.memory_space<vmem>>, vector<16x1xf32>,
    %23 = vector.extract_strided_slice %14 {offsets = [16, 0], sizes = [16, 24], strides = [1, 1]} : vector<32x24xf32> to vector<16x24xf32>
    %cst_14 = arith.constant dense<0.000000e+00> : vector<16x16xf32>
    %24 = tpu.matmul %23, %23, %cst_14 {dimension_numbers = #tpu.dot_dimension_numbers<[1], [1], [0], [0], [0, 0, 1, 0], [], []>} : vector<16x24xf32>, vector<16x24xf32>, vector<16x16xf32> -> vector<16x16xf32>
    %c1 = arith.constant 1 : index
    %c0_15 = arith.constant 0 : index
    %c0_16 = arith.constant 0 : index
    %25 = vector.load %arg4[%c1, %c0_15, %c0_16] : memref<2x16x16xf32, #tpu.memory_space<vmem>>, vector<1x16x16xf32>
    %26 = vector.shape_cast %25 : vector<1x16x16xf32> to vector<16x16xf32>
    %27 = vector.shape_cast %24 : vector<16x16xf32> to vector<1x16x16xf32>
    tpu.vector_store %arg4[%c1, %c0_15, %c0_16], %27 {strides = array<i32>} : memref<2x16x16xf32, #tpu.memory_space<vmem>>, vector<1x16x16xf32>,
    %cst_17 = arith.constant dense<0.000000e+00> : vector<16xf32>
    %28 = vector.multi_reduction <add>, %24, %cst_17 [1] : vector<16x16xf32> to vector<16xf32>
    %29 = vector.shape_cast %28 : vector<16xf32> to vector<16x1xf32>
    %c16 = arith.constant 16 : index
    %c0_18 = arith.constant 0 : index
    %30 = vector.load %arg5[%c16, %c0_18] : memref<32x1xf32, #tpu.memory_space<vmem>>, vector<16x1xf32>
    tpu.vector_store %arg5[%c16, %c0_18], %29 {strides = array<i32>} : memref<32x1xf32, #tpu.memory_space<vmem>>, vector<16x1xf32>,
    return
  }
  func.func @transform_0(%arg0: i32) -> (i32, i32) {
    %c0_i32 = arith.constant 0 : i32
    %c0_i32_0 = arith.constant 0 : i32
    %c0_i32_1 = arith.constant 0 : i32
    return %c0_i32, %c0_i32_0 : i32, i32
  }
  func.func @transform_1(%arg0: i32) -> (i32, i32) {
    %c0_i32 = arith.constant 0 : i32
    %c0_i32_0 = arith.constant 0 : i32
    %c0_i32_1 = arith.constant 0 : i32
    return %c0_i32, %c0_i32_0 : i32, i32
  }
  func.func @transform_2(%arg0: i32) -> (i32, i32) {
    %c0_i32 = arith.constant 0 : i32
    %c0_i32_0 = arith.constant 0 : i32
    %c0_i32_1 = arith.constant 0 : i32
    return %c0_i32, %c0_i32_0 : i32, i32
  }
  func.func @transform_3(%arg0: i32) -> (i32, i32, i32) {
    %c0_i32 = arith.constant 0 : i32
    %c0_i32_0 = arith.constant 0 : i32
    %c0_i32_1 = arith.constant 0 : i32
    %c0_i32_2 = arith.constant 0 : i32
    return %c0_i32, %c0_i32_0, %c0_i32_1 : i32, i32, i32
  }
  func.func @transform_4(%arg0: i32) -> (i32, i32) {
    %c0_i32 = arith.constant 0 : i32
    %c0_i32_0 = arith.constant 0 : i32
    %c0_i32_1 = arith.constant 0 : i32
    return %c0_i32, %c0_i32_0 : i32, i32
  }
}

module attributes {stable_mosaic.version = 11 : i64} {
  func.func @_block1_kernel(%arg0: i32, %arg1: memref<32x16xf32, #tpu.memory_space<vmem>>, %arg2: memref<32x16xf32, #tpu.memory_space<vmem>>, %arg3: memref<32x1xf32, #tpu.memory_space<vmem>>, %arg4: memref<16x16xf32, #tpu.memory_space<vmem>>, %arg5: memref<1x16xf32, #tpu.memory_space<vmem>>, %arg6: memref<16x16xf32, #tpu.memory_space<vmem>>, %arg7: memref<1x16xf32, #tpu.memory_space<vmem>>, %arg8: memref<16x16xf32, #tpu.memory_space<vmem>>, %arg9: memref<1x16xf32, #tpu.memory_space<vmem>>, %arg10: memref<32x16xf32, #tpu.memory_space<vmem>>) attributes {dimension_semantics = [#tpu.dimension_semantics<parallel>], iteration_bounds = array<i64: 1>, scalar_prefetch = 0 : i64, scratch_operands = 0 : i64, tpu.core_type = #tpu.core_type<tc>, window_params = [{transform_indices = @transform_0, window_bounds = array<i64: 32, 16>}, {transform_indices = @transform_1, window_bounds = array<i64: 32, 16>}, {transform_indices = @transform_2, window_bounds = array<i64: 32, 1>}, {pipeline_mode = #tpu.pipeline_mode<synchronous>, transform_indices = @transform_3, window_bounds = array<i64: 16, 16>}, {pipeline_mode = #tpu.pipeline_mode<synchronous>, transform_indices = @transform_4, window_bounds = array<i64: 1, 16>}, {pipeline_mode = #tpu.pipeline_mode<synchronous>, transform_indices = @transform_5, window_bounds = array<i64: 16, 16>}, {pipeline_mode = #tpu.pipeline_mode<synchronous>, transform_indices = @transform_6, window_bounds = array<i64: 1, 16>}, {pipeline_mode = #tpu.pipeline_mode<synchronous>, transform_indices = @transform_7, window_bounds = array<i64: 16, 16>}, {pipeline_mode = #tpu.pipeline_mode<synchronous>, transform_indices = @transform_8, window_bounds = array<i64: 1, 16>}, {transform_indices = @transform_9, window_bounds = array<i64: 32, 16>}]} {
    %c0 = arith.constant 0 : index
    %c0_0 = arith.constant 0 : index
    %0 = vector.load %arg1[%c0, %c0_0] : memref<32x16xf32, #tpu.memory_space<vmem>>, vector<32x16xf32>
    %c0_1 = arith.constant 0 : index
    %c0_2 = arith.constant 0 : index
    %1 = vector.load %arg4[%c0_1, %c0_2] : memref<16x16xf32, #tpu.memory_space<vmem>>, vector<16x16xf32>
    %cst = arith.constant dense<0.000000e+00> : vector<32x16xf32>
    %2 = tpu.matmul %0, %1, %cst {dimension_numbers = #tpu.dot_dimension_numbers<[1], [0], [0], [1], [0, 0, 1, 1], [], []>} : vector<32x16xf32>, vector<16x16xf32>, vector<32x16xf32> -> vector<32x16xf32>
    %c0_3 = arith.constant 0 : index
    %c0_4 = arith.constant 0 : index
    %3 = vector.load %arg5[%c0_3, %c0_4] : memref<1x16xf32, #tpu.memory_space<vmem>>, vector<1x16xf32>
    %4 = vector.broadcast %3 : vector<1x16xf32> to vector<32x16xf32>
    %5 = arith.addf %2, %4 : vector<32x16xf32>
    %cst_5 = arith.constant 0.000000e+00 : f32
    %6 = vector.broadcast %cst_5 : f32 to vector<32x16xf32>
    %7 = arith.cmpf oge, %5, %6 : vector<32x16xf32>
    %cst_6 = arith.constant 2.000000e-01 : f32
    %8 = vector.broadcast %cst_6 : f32 to vector<32x16xf32>
    %9 = arith.mulf %8, %5 : vector<32x16xf32>
    %10 = arith.select %7, %5, %9 : vector<32x16xi1>, vector<32x16xf32>
    %c0_7 = arith.constant 0 : index
    %c0_8 = arith.constant 0 : index
    %11 = vector.load %arg2[%c0_7, %c0_8] : memref<32x16xf32, #tpu.memory_space<vmem>>, vector<32x16xf32>
    %12 = arith.addf %11, %10 : vector<32x16xf32>
    %c0_9 = arith.constant 0 : index
    %c0_10 = arith.constant 0 : index
    %13 = vector.load %arg3[%c0_9, %c0_10] : memref<32x1xf32, #tpu.memory_space<vmem>>, vector<32x1xf32>
    %14 = vector.broadcast %13 : vector<32x1xf32> to vector<32x16xf32>
    %15 = arith.mulf %14, %12 : vector<32x16xf32>
    %c0_11 = arith.constant 0 : index
    %c0_12 = arith.constant 0 : index
    %16 = vector.load %arg6[%c0_11, %c0_12] : memref<16x16xf32, #tpu.memory_space<vmem>>, vector<16x16xf32>
    %cst_13 = arith.constant dense<0.000000e+00> : vector<32x16xf32>
    %17 = tpu.matmul %15, %16, %cst_13 {dimension_numbers = #tpu.dot_dimension_numbers<[1], [0], [0], [1], [0, 0, 1, 1], [], []>} : vector<32x16xf32>, vector<16x16xf32>, vector<32x16xf32> -> vector<32x16xf32>
    %c0_14 = arith.constant 0 : index
    %c0_15 = arith.constant 0 : index
    %18 = vector.load %arg7[%c0_14, %c0_15] : memref<1x16xf32, #tpu.memory_space<vmem>>, vector<1x16xf32>
    %19 = vector.broadcast %18 : vector<1x16xf32> to vector<32x16xf32>
    %20 = arith.addf %17, %19 : vector<32x16xf32>
    %cst_16 = arith.constant 0.000000e+00 : f32
    %21 = vector.broadcast %cst_16 : f32 to vector<32x16xf32>
    %22 = arith.cmpf oge, %20, %21 : vector<32x16xf32>
    %cst_17 = arith.constant 2.000000e-01 : f32
    %23 = vector.broadcast %cst_17 : f32 to vector<32x16xf32>
    %24 = arith.mulf %23, %20 : vector<32x16xf32>
    %25 = arith.select %22, %20, %24 : vector<32x16xi1>, vector<32x16xf32>
    %c0_18 = arith.constant 0 : index
    %c0_19 = arith.constant 0 : index
    %26 = vector.load %arg8[%c0_18, %c0_19] : memref<16x16xf32, #tpu.memory_space<vmem>>, vector<16x16xf32>
    %cst_20 = arith.constant dense<0.000000e+00> : vector<32x16xf32>
    %27 = tpu.matmul %25, %26, %cst_20 {dimension_numbers = #tpu.dot_dimension_numbers<[1], [0], [0], [1], [0, 0, 1, 1], [], []>} : vector<32x16xf32>, vector<16x16xf32>, vector<32x16xf32> -> vector<32x16xf32>
    %c0_21 = arith.constant 0 : index
    %c0_22 = arith.constant 0 : index
    %28 = vector.load %arg9[%c0_21, %c0_22] : memref<1x16xf32, #tpu.memory_space<vmem>>, vector<1x16xf32>
    %29 = vector.broadcast %28 : vector<1x16xf32> to vector<32x16xf32>
    %30 = arith.addf %27, %29 : vector<32x16xf32>
    %c0_23 = arith.constant 0 : index
    %c0_24 = arith.constant 0 : index
    %31 = vector.load %arg10[%c0_23, %c0_24] : memref<32x16xf32, #tpu.memory_space<vmem>>, vector<32x16xf32>
    tpu.vector_store %arg10[%c0_23, %c0_24], %30 {strides = array<i32>} : memref<32x16xf32, #tpu.memory_space<vmem>>, vector<32x16xf32>,
    return
  }
  func.func @transform_0(%arg0: i32) -> (i32, i32) {
    %c0_i32 = arith.constant 0 : i32
    %c0_i32_0 = arith.constant 0 : i32
    return %arg0, %c0_i32 : i32, i32
  }
  func.func @transform_1(%arg0: i32) -> (i32, i32) {
    %c0_i32 = arith.constant 0 : i32
    %c0_i32_0 = arith.constant 0 : i32
    return %arg0, %c0_i32 : i32, i32
  }
  func.func @transform_2(%arg0: i32) -> (i32, i32) {
    %c0_i32 = arith.constant 0 : i32
    %c0_i32_0 = arith.constant 0 : i32
    return %arg0, %c0_i32 : i32, i32
  }
  func.func @transform_3(%arg0: i32) -> (i32, i32) {
    %c0_i32 = arith.constant 0 : i32
    %c0_i32_0 = arith.constant 0 : i32
    %c0_i32_1 = arith.constant 0 : i32
    return %c0_i32, %c0_i32_0 : i32, i32
  }
  func.func @transform_4(%arg0: i32) -> (i32, i32) {
    %c0_i32 = arith.constant 0 : i32
    %c0_i32_0 = arith.constant 0 : i32
    %c0_i32_1 = arith.constant 0 : i32
    return %c0_i32, %c0_i32_0 : i32, i32
  }
  func.func @transform_5(%arg0: i32) -> (i32, i32) {
    %c0_i32 = arith.constant 0 : i32
    %c0_i32_0 = arith.constant 0 : i32
    %c0_i32_1 = arith.constant 0 : i32
    return %c0_i32, %c0_i32_0 : i32, i32
  }
  func.func @transform_6(%arg0: i32) -> (i32, i32) {
    %c0_i32 = arith.constant 0 : i32
    %c0_i32_0 = arith.constant 0 : i32
    %c0_i32_1 = arith.constant 0 : i32
    return %c0_i32, %c0_i32_0 : i32, i32
  }
  func.func @transform_7(%arg0: i32) -> (i32, i32) {
    %c0_i32 = arith.constant 0 : i32
    %c0_i32_0 = arith.constant 0 : i32
    %c0_i32_1 = arith.constant 0 : i32
    return %c0_i32, %c0_i32_0 : i32, i32
  }
  func.func @transform_8(%arg0: i32) -> (i32, i32) {
    %c0_i32 = arith.constant 0 : i32
    %c0_i32_0 = arith.constant 0 : i32
    %c0_i32_1 = arith.constant 0 : i32
    return %c0_i32, %c0_i32_0 : i32, i32
  }
  func.func @transform_9(%arg0: i32) -> (i32, i32) {
    %c0_i32 = arith.constant 0 : i32
    %c0_i32_0 = arith.constant 0 : i32
    return %arg0, %c0_i32 : i32, i32
  }
}

module attributes {stable_mosaic.version = 11 : i64} {
  func.func @_block2_kernel(%arg0: i32, %arg1: memref<32x16xf32, #tpu.memory_space<vmem>>, %arg2: memref<1x16xf32, #tpu.memory_space<vmem>>, %arg3: memref<1x16xf32, #tpu.memory_space<vmem>>, %arg4: memref<32x1xf32, #tpu.memory_space<vmem>>, %arg5: memref<16x16xf32, #tpu.memory_space<vmem>>, %arg6: memref<1x16xf32, #tpu.memory_space<vmem>>, %arg7: memref<32x16xf32, #tpu.memory_space<vmem>>) attributes {dimension_semantics = [#tpu.dimension_semantics<parallel>], iteration_bounds = array<i64: 1>, scalar_prefetch = 0 : i64, scratch_operands = 0 : i64, tpu.core_type = #tpu.core_type<tc>, window_params = [{transform_indices = @transform_0, window_bounds = array<i64: 32, 16>}, {pipeline_mode = #tpu.pipeline_mode<synchronous>, transform_indices = @transform_1, window_bounds = array<i64: 1, 16>}, {pipeline_mode = #tpu.pipeline_mode<synchronous>, transform_indices = @transform_2, window_bounds = array<i64: 1, 16>}, {transform_indices = @transform_3, window_bounds = array<i64: 32, 1>}, {pipeline_mode = #tpu.pipeline_mode<synchronous>, transform_indices = @transform_4, window_bounds = array<i64: 16, 16>}, {pipeline_mode = #tpu.pipeline_mode<synchronous>, transform_indices = @transform_5, window_bounds = array<i64: 1, 16>}, {transform_indices = @transform_6, window_bounds = array<i64: 32, 16>}]} {
    %c0 = arith.constant 0 : index
    %c0_0 = arith.constant 0 : index
    %0 = vector.load %arg1[%c0, %c0_0] : memref<32x16xf32, #tpu.memory_space<vmem>>, vector<32x16xf32>
    %c0_1 = arith.constant 0 : index
    %c0_2 = arith.constant 0 : index
    %1 = vector.load %arg2[%c0_1, %c0_2] : memref<1x16xf32, #tpu.memory_space<vmem>>, vector<1x16xf32>
    %2 = vector.broadcast %1 : vector<1x16xf32> to vector<32x16xf32>
    %3 = arith.mulf %0, %2 : vector<32x16xf32>
    %c0_3 = arith.constant 0 : index
    %c0_4 = arith.constant 0 : index
    %4 = vector.load %arg3[%c0_3, %c0_4] : memref<1x16xf32, #tpu.memory_space<vmem>>, vector<1x16xf32>
    %5 = vector.broadcast %4 : vector<1x16xf32> to vector<32x16xf32>
    %6 = arith.addf %3, %5 : vector<32x16xf32>
    %c0_5 = arith.constant 0 : index
    %c0_6 = arith.constant 0 : index
    %7 = vector.load %arg4[%c0_5, %c0_6] : memref<32x1xf32, #tpu.memory_space<vmem>>, vector<32x1xf32>
    %8 = vector.broadcast %7 : vector<32x1xf32> to vector<32x16xf32>
    %9 = arith.mulf %8, %6 : vector<32x16xf32>
    %c0_7 = arith.constant 0 : index
    %c0_8 = arith.constant 0 : index
    %10 = vector.load %arg5[%c0_7, %c0_8] : memref<16x16xf32, #tpu.memory_space<vmem>>, vector<16x16xf32>
    %cst = arith.constant dense<0.000000e+00> : vector<32x16xf32>
    %11 = tpu.matmul %9, %10, %cst {dimension_numbers = #tpu.dot_dimension_numbers<[1], [0], [0], [1], [0, 0, 1, 1], [], []>} : vector<32x16xf32>, vector<16x16xf32>, vector<32x16xf32> -> vector<32x16xf32>
    %c0_9 = arith.constant 0 : index
    %c0_10 = arith.constant 0 : index
    %12 = vector.load %arg6[%c0_9, %c0_10] : memref<1x16xf32, #tpu.memory_space<vmem>>, vector<1x16xf32>
    %13 = vector.broadcast %12 : vector<1x16xf32> to vector<32x16xf32>
    %14 = arith.addf %11, %13 : vector<32x16xf32>
    %cst_11 = arith.constant 0.000000e+00 : f32
    %15 = vector.broadcast %cst_11 : f32 to vector<32x16xf32>
    %16 = arith.cmpf oge, %14, %15 : vector<32x16xf32>
    %cst_12 = arith.constant 2.000000e-01 : f32
    %17 = vector.broadcast %cst_12 : f32 to vector<32x16xf32>
    %18 = arith.mulf %17, %14 : vector<32x16xf32>
    %19 = arith.select %16, %14, %18 : vector<32x16xi1>, vector<32x16xf32>
    %c0_13 = arith.constant 0 : index
    %c0_14 = arith.constant 0 : index
    %20 = vector.load %arg7[%c0_13, %c0_14] : memref<32x16xf32, #tpu.memory_space<vmem>>, vector<32x16xf32>
    tpu.vector_store %arg7[%c0_13, %c0_14], %19 {strides = array<i32>} : memref<32x16xf32, #tpu.memory_space<vmem>>, vector<32x16xf32>,
    return
  }
  func.func @transform_0(%arg0: i32) -> (i32, i32) {
    %c0_i32 = arith.constant 0 : i32
    %c0_i32_0 = arith.constant 0 : i32
    return %arg0, %c0_i32 : i32, i32
  }
  func.func @transform_1(%arg0: i32) -> (i32, i32) {
    %c0_i32 = arith.constant 0 : i32
    %c0_i32_0 = arith.constant 0 : i32
    %c0_i32_1 = arith.constant 0 : i32
    return %c0_i32, %c0_i32_0 : i32, i32
  }
  func.func @transform_2(%arg0: i32) -> (i32, i32) {
    %c0_i32 = arith.constant 0 : i32
    %c0_i32_0 = arith.constant 0 : i32
    %c0_i32_1 = arith.constant 0 : i32
    return %c0_i32, %c0_i32_0 : i32, i32
  }
  func.func @transform_3(%arg0: i32) -> (i32, i32) {
    %c0_i32 = arith.constant 0 : i32
    %c0_i32_0 = arith.constant 0 : i32
    return %arg0, %c0_i32 : i32, i32
  }
  func.func @transform_4(%arg0: i32) -> (i32, i32) {
    %c0_i32 = arith.constant 0 : i32
    %c0_i32_0 = arith.constant 0 : i32
    %c0_i32_1 = arith.constant 0 : i32
    return %c0_i32, %c0_i32_0 : i32, i32
  }
  func.func @transform_5(%arg0: i32) -> (i32, i32) {
    %c0_i32 = arith.constant 0 : i32
    %c0_i32_0 = arith.constant 0 : i32
    %c0_i32_1 = arith.constant 0 : i32
    return %c0_i32, %c0_i32_0 : i32, i32
  }
  func.func @transform_6(%arg0: i32) -> (i32, i32) {
    %c0_i32 = arith.constant 0 : i32
    %c0_i32_0 = arith.constant 0 : i32
    return %arg0, %c0_i32 : i32, i32
  }
}

module attributes {stable_mosaic.version = 11 : i64} {
  func.func @_block3_kernel(%arg0: i32, %arg1: memref<32x16xf32, #tpu.memory_space<vmem>>, %arg2: memref<1x16xf32, #tpu.memory_space<vmem>>, %arg3: memref<1x16xf32, #tpu.memory_space<vmem>>, %arg4: memref<32x1xf32, #tpu.memory_space<vmem>>, %arg5: memref<16x64xf32, #tpu.memory_space<vmem>>, %arg6: memref<1x64xf32, #tpu.memory_space<vmem>>, %arg7: memref<64x8xf32, #tpu.memory_space<vmem>>, %arg8: memref<1x8xf32, #tpu.memory_space<vmem>>, %arg9: memref<32x8xf32, #tpu.memory_space<vmem>>) attributes {dimension_semantics = [#tpu.dimension_semantics<parallel>], iteration_bounds = array<i64: 1>, scalar_prefetch = 0 : i64, scratch_operands = 0 : i64, tpu.core_type = #tpu.core_type<tc>, window_params = [{transform_indices = @transform_0, window_bounds = array<i64: 32, 16>}, {pipeline_mode = #tpu.pipeline_mode<synchronous>, transform_indices = @transform_1, window_bounds = array<i64: 1, 16>}, {pipeline_mode = #tpu.pipeline_mode<synchronous>, transform_indices = @transform_2, window_bounds = array<i64: 1, 16>}, {transform_indices = @transform_3, window_bounds = array<i64: 32, 1>}, {pipeline_mode = #tpu.pipeline_mode<synchronous>, transform_indices = @transform_4, window_bounds = array<i64: 16, 64>}, {pipeline_mode = #tpu.pipeline_mode<synchronous>, transform_indices = @transform_5, window_bounds = array<i64: 1, 64>}, {pipeline_mode = #tpu.pipeline_mode<synchronous>, transform_indices = @transform_6, window_bounds = array<i64: 64, 8>}, {pipeline_mode = #tpu.pipeline_mode<synchronous>, transform_indices = @transform_7, window_bounds = array<i64: 1, 8>}, {transform_indices = @transform_8, window_bounds = array<i64: 32, 8>}]} {
    %c0 = arith.constant 0 : index
    %c0_0 = arith.constant 0 : index
    %0 = vector.load %arg1[%c0, %c0_0] : memref<32x16xf32, #tpu.memory_space<vmem>>, vector<32x16xf32>
    %c0_1 = arith.constant 0 : index
    %c0_2 = arith.constant 0 : index
    %1 = vector.load %arg2[%c0_1, %c0_2] : memref<1x16xf32, #tpu.memory_space<vmem>>, vector<1x16xf32>
    %2 = vector.broadcast %1 : vector<1x16xf32> to vector<32x16xf32>
    %3 = arith.mulf %0, %2 : vector<32x16xf32>
    %c0_3 = arith.constant 0 : index
    %c0_4 = arith.constant 0 : index
    %4 = vector.load %arg3[%c0_3, %c0_4] : memref<1x16xf32, #tpu.memory_space<vmem>>, vector<1x16xf32>
    %5 = vector.broadcast %4 : vector<1x16xf32> to vector<32x16xf32>
    %6 = arith.addf %3, %5 : vector<32x16xf32>
    %c0_5 = arith.constant 0 : index
    %c0_6 = arith.constant 0 : index
    %7 = vector.load %arg4[%c0_5, %c0_6] : memref<32x1xf32, #tpu.memory_space<vmem>>, vector<32x1xf32>
    %8 = vector.broadcast %7 : vector<32x1xf32> to vector<32x16xf32>
    %9 = arith.mulf %8, %6 : vector<32x16xf32>
    %c0_7 = arith.constant 0 : index
    %c0_8 = arith.constant 0 : index
    %10 = vector.load %arg5[%c0_7, %c0_8] : memref<16x64xf32, #tpu.memory_space<vmem>>, vector<16x64xf32>
    %cst = arith.constant dense<0.000000e+00> : vector<32x64xf32>
    %11 = tpu.matmul %9, %10, %cst {dimension_numbers = #tpu.dot_dimension_numbers<[1], [0], [0], [1], [0, 0, 1, 1], [], []>} : vector<32x16xf32>, vector<16x64xf32>, vector<32x64xf32> -> vector<32x64xf32>
    %c0_9 = arith.constant 0 : index
    %c0_10 = arith.constant 0 : index
    %12 = vector.load %arg6[%c0_9, %c0_10] : memref<1x64xf32, #tpu.memory_space<vmem>>, vector<1x64xf32>
    %13 = vector.broadcast %12 : vector<1x64xf32> to vector<32x64xf32>
    %14 = arith.addf %11, %13 : vector<32x64xf32>
    %cst_11 = arith.constant 0.000000e+00 : f32
    %15 = vector.broadcast %cst_11 : f32 to vector<32x64xf32>
    %16 = arith.cmpf oge, %14, %15 : vector<32x64xf32>
    %cst_12 = arith.constant 2.000000e-01 : f32
    %17 = vector.broadcast %cst_12 : f32 to vector<32x64xf32>
    %18 = arith.mulf %17, %14 : vector<32x64xf32>
    %19 = arith.select %16, %14, %18 : vector<32x64xi1>, vector<32x64xf32>
    %c0_13 = arith.constant 0 : index
    %c0_14 = arith.constant 0 : index
    %20 = vector.load %arg7[%c0_13, %c0_14] : memref<64x8xf32, #tpu.memory_space<vmem>>, vector<64x8xf32>
    %cst_15 = arith.constant dense<0.000000e+00> : vector<32x8xf32>
    %21 = tpu.matmul %19, %20, %cst_15 {dimension_numbers = #tpu.dot_dimension_numbers<[1], [0], [0], [1], [0, 0, 1, 1], [], []>} : vector<32x64xf32>, vector<64x8xf32>, vector<32x8xf32> -> vector<32x8xf32>
    %c0_16 = arith.constant 0 : index
    %c0_17 = arith.constant 0 : index
    %22 = vector.load %arg8[%c0_16, %c0_17] : memref<1x8xf32, #tpu.memory_space<vmem>>, vector<1x8xf32>
    %23 = vector.broadcast %22 : vector<1x8xf32> to vector<32x8xf32>
    %24 = arith.addf %21, %23 : vector<32x8xf32>
    %cst_18 = arith.constant 0.000000e+00 : f32
    %25 = vector.broadcast %cst_18 : f32 to vector<32x8xf32>
    %26 = arith.cmpf oge, %24, %25 : vector<32x8xf32>
    %cst_19 = arith.constant 2.000000e-01 : f32
    %27 = vector.broadcast %cst_19 : f32 to vector<32x8xf32>
    %28 = arith.mulf %27, %24 : vector<32x8xf32>
    %29 = arith.select %26, %24, %28 : vector<32x8xi1>, vector<32x8xf32>
    %c0_20 = arith.constant 0 : index
    %c0_21 = arith.constant 0 : index
    %30 = vector.load %arg9[%c0_20, %c0_21] : memref<32x8xf32, #tpu.memory_space<vmem>>, vector<32x8xf32>
    tpu.vector_store %arg9[%c0_20, %c0_21], %29 {strides = array<i32>} : memref<32x8xf32, #tpu.memory_space<vmem>>, vector<32x8xf32>,
    return
  }
  func.func @transform_0(%arg0: i32) -> (i32, i32) {
    %c0_i32 = arith.constant 0 : i32
    %c0_i32_0 = arith.constant 0 : i32
    return %arg0, %c0_i32 : i32, i32
  }
  func.func @transform_1(%arg0: i32) -> (i32, i32) {
    %c0_i32 = arith.constant 0 : i32
    %c0_i32_0 = arith.constant 0 : i32
    %c0_i32_1 = arith.constant 0 : i32
    return %c0_i32, %c0_i32_0 : i32, i32
  }
  func.func @transform_2(%arg0: i32) -> (i32, i32) {
    %c0_i32 = arith.constant 0 : i32
    %c0_i32_0 = arith.constant 0 : i32
    %c0_i32_1 = arith.constant 0 : i32
    return %c0_i32, %c0_i32_0 : i32, i32
  }
  func.func @transform_3(%arg0: i32) -> (i32, i32) {
    %c0_i32 = arith.constant 0 : i32
    %c0_i32_0 = arith.constant 0 : i32
    return %arg0, %c0_i32 : i32, i32
  }
  func.func @transform_4(%arg0: i32) -> (i32, i32) {
    %c0_i32 = arith.constant 0 : i32
    %c0_i32_0 = arith.constant 0 : i32
    %c0_i32_1 = arith.constant 0 : i32
    return %c0_i32, %c0_i32_0 : i32, i32
  }
  func.func @transform_5(%arg0: i32) -> (i32, i32) {
    %c0_i32 = arith.constant 0 : i32
    %c0_i32_0 = arith.constant 0 : i32
    %c0_i32_1 = arith.constant 0 : i32
    return %c0_i32, %c0_i32_0 : i32, i32
  }
  func.func @transform_6(%arg0: i32) -> (i32, i32) {
    %c0_i32 = arith.constant 0 : i32
    %c0_i32_0 = arith.constant 0 : i32
    %c0_i32_1 = arith.constant 0 : i32
    return %c0_i32, %c0_i32_0 : i32, i32
  }
  func.func @transform_7(%arg0: i32) -> (i32, i32) {
    %c0_i32 = arith.constant 0 : i32
    %c0_i32_0 = arith.constant 0 : i32
    %c0_i32_1 = arith.constant 0 : i32
    return %c0_i32, %c0_i32_0 : i32, i32
  }
  func.func @transform_8(%arg0: i32) -> (i32, i32) {
    %c0_i32 = arith.constant 0 : i32
    %c0_i32_0 = arith.constant 0 : i32
    return %arg0, %c0_i32 : i32, i32
  }
}

module attributes {stable_mosaic.version = 11 : i64} {
  func.func @_mlp3_kernel(%arg0: i32, %arg1: memref<2x88xf32, #tpu.memory_space<vmem>>, %arg2: memref<88x256xf32, #tpu.memory_space<vmem>>, %arg3: memref<1x256xf32, #tpu.memory_space<vmem>>, %arg4: memref<256x32xf32, #tpu.memory_space<vmem>>, %arg5: memref<1x32xf32, #tpu.memory_space<vmem>>, %arg6: memref<32x2xf32, #tpu.memory_space<vmem>>, %arg7: memref<1x2xf32, #tpu.memory_space<vmem>>, %arg8: memref<2x2xf32, #tpu.memory_space<vmem>>) attributes {dimension_semantics = [#tpu.dimension_semantics<parallel>], iteration_bounds = array<i64: 1>, scalar_prefetch = 0 : i64, scratch_operands = 0 : i64, tpu.core_type = #tpu.core_type<tc>, window_params = [{transform_indices = @transform_0, window_bounds = array<i64: 2, 88>}, {pipeline_mode = #tpu.pipeline_mode<synchronous>, transform_indices = @transform_1, window_bounds = array<i64: 88, 256>}, {pipeline_mode = #tpu.pipeline_mode<synchronous>, transform_indices = @transform_2, window_bounds = array<i64: 1, 256>}, {pipeline_mode = #tpu.pipeline_mode<synchronous>, transform_indices = @transform_3, window_bounds = array<i64: 256, 32>}, {pipeline_mode = #tpu.pipeline_mode<synchronous>, transform_indices = @transform_4, window_bounds = array<i64: 1, 32>}, {pipeline_mode = #tpu.pipeline_mode<synchronous>, transform_indices = @transform_5, window_bounds = array<i64: 32, 2>}, {pipeline_mode = #tpu.pipeline_mode<synchronous>, transform_indices = @transform_6, window_bounds = array<i64: 1, 2>}, {transform_indices = @transform_7, window_bounds = array<i64: 2, 2>}]} {
    %c0 = arith.constant 0 : index
    %c0_0 = arith.constant 0 : index
    %0 = vector.load %arg1[%c0, %c0_0] : memref<2x88xf32, #tpu.memory_space<vmem>>, vector<2x88xf32>
    %c0_1 = arith.constant 0 : index
    %c0_2 = arith.constant 0 : index
    %1 = vector.load %arg2[%c0_1, %c0_2] : memref<88x256xf32, #tpu.memory_space<vmem>>, vector<88x256xf32>
    %cst = arith.constant dense<0.000000e+00> : vector<2x256xf32>
    %2 = tpu.matmul %0, %1, %cst {dimension_numbers = #tpu.dot_dimension_numbers<[1], [0], [0], [1], [0, 0, 1, 1], [], []>} : vector<2x88xf32>, vector<88x256xf32>, vector<2x256xf32> -> vector<2x256xf32>
    %c0_3 = arith.constant 0 : index
    %c0_4 = arith.constant 0 : index
    %3 = vector.load %arg3[%c0_3, %c0_4] : memref<1x256xf32, #tpu.memory_space<vmem>>, vector<1x256xf32>
    %4 = vector.broadcast %3 : vector<1x256xf32> to vector<2x256xf32>
    %5 = arith.addf %2, %4 : vector<2x256xf32>
    %cst_5 = arith.constant 0.000000e+00 : f32
    %6 = vector.broadcast %cst_5 : f32 to vector<2x256xf32>
    %7 = arith.cmpf oge, %5, %6 : vector<2x256xf32>
    %cst_6 = arith.constant 2.000000e-01 : f32
    %8 = vector.broadcast %cst_6 : f32 to vector<2x256xf32>
    %9 = arith.mulf %8, %5 : vector<2x256xf32>
    %10 = arith.select %7, %5, %9 : vector<2x256xi1>, vector<2x256xf32>
    %c0_7 = arith.constant 0 : index
    %c0_8 = arith.constant 0 : index
    %11 = vector.load %arg4[%c0_7, %c0_8] : memref<256x32xf32, #tpu.memory_space<vmem>>, vector<256x32xf32>
    %cst_9 = arith.constant dense<0.000000e+00> : vector<2x32xf32>
    %12 = tpu.matmul %10, %11, %cst_9 {dimension_numbers = #tpu.dot_dimension_numbers<[1], [0], [0], [1], [0, 0, 1, 1], [], []>} : vector<2x256xf32>, vector<256x32xf32>, vector<2x32xf32> -> vector<2x32xf32>
    %c0_10 = arith.constant 0 : index
    %c0_11 = arith.constant 0 : index
    %13 = vector.load %arg5[%c0_10, %c0_11] : memref<1x32xf32, #tpu.memory_space<vmem>>, vector<1x32xf32>
    %14 = vector.broadcast %13 : vector<1x32xf32> to vector<2x32xf32>
    %15 = arith.addf %12, %14 : vector<2x32xf32>
    %cst_12 = arith.constant 0.000000e+00 : f32
    %16 = vector.broadcast %cst_12 : f32 to vector<2x32xf32>
    %17 = arith.cmpf oge, %15, %16 : vector<2x32xf32>
    %cst_13 = arith.constant 2.000000e-01 : f32
    %18 = vector.broadcast %cst_13 : f32 to vector<2x32xf32>
    %19 = arith.mulf %18, %15 : vector<2x32xf32>
    %20 = arith.select %17, %15, %19 : vector<2x32xi1>, vector<2x32xf32>
    %c0_14 = arith.constant 0 : index
    %c0_15 = arith.constant 0 : index
    %21 = vector.load %arg6[%c0_14, %c0_15] : memref<32x2xf32, #tpu.memory_space<vmem>>, vector<32x2xf32>
    %cst_16 = arith.constant dense<0.000000e+00> : vector<2x2xf32>
    %22 = tpu.matmul %20, %21, %cst_16 {dimension_numbers = #tpu.dot_dimension_numbers<[1], [0], [0], [1], [0, 0, 1, 1], [], []>} : vector<2x32xf32>, vector<32x2xf32>, vector<2x2xf32> -> vector<2x2xf32>
    %c0_17 = arith.constant 0 : index
    %c0_18 = arith.constant 0 : index
    %23 = vector.load %arg7[%c0_17, %c0_18] : memref<1x2xf32, #tpu.memory_space<vmem>>, vector<1x2xf32>
    %24 = vector.broadcast %23 : vector<1x2xf32> to vector<2x2xf32>
    %25 = arith.addf %22, %24 : vector<2x2xf32>
    %c0_19 = arith.constant 0 : index
    %c0_20 = arith.constant 0 : index
    %26 = vector.load %arg8[%c0_19, %c0_20] : memref<2x2xf32, #tpu.memory_space<vmem>>, vector<2x2xf32>
    tpu.vector_store %arg8[%c0_19, %c0_20], %25 {strides = array<i32>} : memref<2x2xf32, #tpu.memory_space<vmem>>, vector<2x2xf32>,
    return
  }
  func.func @transform_0(%arg0: i32) -> (i32, i32) {
    %c0_i32 = arith.constant 0 : i32
    %c0_i32_0 = arith.constant 0 : i32
    return %arg0, %c0_i32 : i32, i32
  }
  func.func @transform_1(%arg0: i32) -> (i32, i32) {
    %c0_i32 = arith.constant 0 : i32
    %c0_i32_0 = arith.constant 0 : i32
    %c0_i32_1 = arith.constant 0 : i32
    return %c0_i32, %c0_i32_0 : i32, i32
  }
  func.func @transform_2(%arg0: i32) -> (i32, i32) {
    %c0_i32 = arith.constant 0 : i32
    %c0_i32_0 = arith.constant 0 : i32
    %c0_i32_1 = arith.constant 0 : i32
    return %c0_i32, %c0_i32_0 : i32, i32
  }
  func.func @transform_3(%arg0: i32) -> (i32, i32) {
    %c0_i32 = arith.constant 0 : i32
    %c0_i32_0 = arith.constant 0 : i32
    %c0_i32_1 = arith.constant 0 : i32
    return %c0_i32, %c0_i32_0 : i32, i32
  }
  func.func @transform_4(%arg0: i32) -> (i32, i32) {
    %c0_i32 = arith.constant 0 : i32
    %c0_i32_0 = arith.constant 0 : i32
    %c0_i32_1 = arith.constant 0 : i32
    return %c0_i32, %c0_i32_0 : i32, i32
  }
  func.func @transform_5(%arg0: i32) -> (i32, i32) {
    %c0_i32 = arith.constant 0 : i32
    %c0_i32_0 = arith.constant 0 : i32
    %c0_i32_1 = arith.constant 0 : i32
    return %c0_i32, %c0_i32_0 : i32, i32
  }
  func.func @transform_6(%arg0: i32) -> (i32, i32) {
    %c0_i32 = arith.constant 0 : i32
    %c0_i32_0 = arith.constant 0 : i32
    %c0_i32_1 = arith.constant 0 : i32
    return %c0_i32, %c0_i32_0 : i32, i32
  }
  func.func @transform_7(%arg0: i32) -> (i32, i32) {
    %c0_i32 = arith.constant 0 : i32
    %c0_i32_0 = arith.constant 0 : i32
    return %arg0, %c0_i32 : i32, i32
  }
}

</mosaic_0001>

<bundles_post_ra>
// kernel: plsnet_forward.6
= control target key start
LH: loop header
LB: loop body
LE: loop exit
PB: predicated region body
PF: predicated region fallthrough
CT: control target
= control target key end

     0   :  { %v270_v2 = vmov 0   ;;  %vm42_vm0 = vcmask 130048   ;;  %s412_s3 = inlined_call_operand.vmem [shape: f32[16,16], index: 3, kind: input, shape index: {}]   ;;  %s413_s0 = inlined_call_operand.vmem [shape: f32[32,16], index: 0, kind: input, shape index: {}]   ;;  %s414_s2 = inlined_call_operand.vmem [shape: f32[32,1], index: 2, kind: input, shape index: {}]   ;;  %s415_s4 = inlined_call_operand.vmem [shape: f32[1,16], index: 4, kind: input, shape index: {}]   ;;  %s416_s6 = inlined_call_operand.vmem [shape: f32[1,16], index: 6, kind: input, shape index: {}]   ;;  %s417_s5 = inlined_call_operand.vmem [shape: f32[16,16], index: 5, kind: input, shape index: {}]   ;;  %s418_s1 = inlined_call_operand.vmem [shape: f32[32,16], index: 1, kind: input, shape index: {}]   ;;  %s419_s8 = inlined_call_operand.vmem [shape: f32[1,16], index: 8, kind: input, shape index: {}]   ;;  %s420_s7 = inlined_call_operand.vmem [shape: f32[16,16], index: 7, kind: input, shape index: {}]   ;;  %s421_s9 = inlined_call_operand.vmem [shape: f32[32,16], index: 9, kind: output, shape index: {}]  }
   0x1   :  { %v37_v0 = vld [vmem:[%s412_s3 + $0x8] sm:$0xff]  ;;  %v36_v1 = vld [vmem:[%s412_s3] sm:$0xff]  ;;  %265 = vset.pattern.permute.xlu0 %v270_v2  ;;  %266 = vset.pattern.permute.xlu1 %v270_v2  ;;  %v107_v6 = vld [vmem:[%s414_s2 + $0x18] sm:$0xff] }
   0x2   :  { %258 = vmatpush.msra.mxu3 %v37_v0  ;;  %v33_v3 = vld [vmem:[%s413_s0 + $0x8] sm:$0xff]  ;;  %69 = vmatpush.msra.mxu0 %v37_v0  ;;  %v32_v5 = vld [vmem:[%s413_s0] sm:$0xff]  ;;  %v106_v7 = vld [vmem:[%s414_s2 + $0x10] sm:$0xff] }
   0x3   :  { %v105_v4 = vld [vmem:[%s414_s2 + $0x8] sm:$0xff]  ;;  %125 = vperm.xlu1 %266, %v107_v6   ;;  %v34_v8 = vld [vmem:[%s413_s0 + $0x10] sm:$0xff]  ;;  %v104_v9 = vld [vmem:[%s414_s2] sm:$0xff] }
   0x4   :  { %115 = vperm.xlu0 %265, %v105_v4   ;;  %259 = vmatpush.msra.mxu3 %v36_v1  ;;  %v35_v10 = vld [vmem:[%s413_s0 + $0x18] sm:$0xff]  ;;  %v133_v11 = vld [vmem:[%s417_s5 + $0x8] sm:$0xff]  ;;  %v132_v12 = vld [vmem:[%s417_s5] sm:$0xff] }
   0x5   :  { %70 = vmatpush.msra.mxu0 %v36_v1  ;;  %247 = vmatmul.msk.f32.vlgmr.msra.gmra.mxu3 %vm42_vm0, %v33_v3  ;;  %v267_v14 = vld [vmem:[%s415_s4] ss:$0 sm:$0xff]  ;;  %v97_v26 = vld [vmem:[%s418_s1 + $0x8] sm:$0xff]  ;;  %v98_v34 = vld [vmem:[%s418_s1 + $0x10] sm:$0xff] }
   0x6   :  { %246 = vmatmul.msk.f32.vlgmr.msra.gmra.mxu0 %vm42_vm0, %v32_v5  ;;  %260 = vmatpush.msra.mxu1 %v133_v11  ;;  %v96_v18 = vld [vmem:[%s418_s1] sm:$0xff]  ;;  %v99_v42 = vld [vmem:[%s418_s1 + $0x18] sm:$0xff]  ;;  %v192_v46 = vld [vmem:[%s420_s7 + $0x8] sm:$0xff] }
   0x7   :  { %164 = vmatpush.msrb.mxu0 %v133_v11  ;;  %262 = vmatpush.msra.mxu2 %v192_v46  ;;  %v191_v47 = vld [vmem:[%s420_s7] sm:$0xff] }
   0x8   :  { %261 = vmatpush.msra.mxu1 %v132_v12  ;;  %v268_v48 = vld [vmem:[%s416_s6] ss:$0 sm:$0xff] }
   0x9   :  { %165 = vmatpush.msrb.mxu0 %v132_v12  ;;  %263 = vmatpush.msra.mxu2 %v191_v47  ;;  %v269_v1 = vld [vmem:[%s419_s8] ss:$0 sm:$0xff] }
   0xb   :  { %110 = vperm.xlu1 %266, %v104_v9   ;;  %223 = vmatpush.msra.mxu0 %v192_v46 }
   0xc   :  { %120 = vperm.xlu0 %265, %v106_v7  }
   0xd   :  { %248 = vmatmul.msk.f32.gmra.mxu3 %vm42_vm0, %v34_v8  ;;  %224 = vmatpush.msra.mxu0 %v191_v47 }
  0x15   :  { %249 = vmatmul.msk.f32.gmra.mxu3 %vm42_vm0, %v35_v10 }
  0x75   :  { %v126_v13 = vpop.permute.xlu1 %125 }
  0x76   :  { %v116_v27 = vpop.permute.xlu0 %115 }
  0x7d   :  { %v111_v19 = vpop.permute.xlu1 %110 }
  0x7e   :  { %v121_v37 = vpop.permute.xlu0 %120 }
  0x83   :  { %v72_v15 = vpop.f32.mrf.mxu0 }
  0x84   :  { %v73_v16 = vadd.f32 %v267_v14, %v72_v15 }
  0x86   :  { %vm84_vm1 = vcmp.ge.f32.partialorder %v73_v16, 0.0  ;;  %v88_v17 = vmul.f32 0.2, %v73_v16 }
  0x88   :  { %v92_v20 = vsel %vm84_vm1, %v73_v16, %v88_v17  ;;  %v75_v21 = vpop.f32.mrf.mxu3 }
  0x89   :  { %v100_v22 = vadd.f32 %v96_v18, %v92_v20  ;;  %v76_v23 = vadd.f32 %v267_v14, %v75_v21 }
  0x8b   :  { %v128_v24 = vmul.f32 %v111_v19, %v100_v22  ;;  %vm85_vm2 = vcmp.ge.f32.partialorder %v76_v23, 0.0  ;;  %v89_v25 = vmul.f32 0.2, %v76_v23 }
  0x8d   :  { %250 = vmatmul.msk.f32.vlgmr.msrb.gmra.mxu0 %vm42_vm0, %v128_v24  ;;  %v93_v28 = vsel %vm85_vm2, %v76_v23, %v89_v25 }
  0x8e   :  { %v101_v29 = vadd.f32 %v97_v26, %v93_v28 }
  0x90   :  { %v78_v30 = vpop.f32.mrf.mxu3  ;;  %v129_v31 = vmul.f32 %v116_v27, %v101_v29 }
  0x91   :  { %v79_v32 = vadd.f32 %v267_v14, %v78_v30 }
  0x92   :  { %251 = vmatmul.msk.f32.vlgmr.msra.gmra.mxu1 %vm42_vm0, %v129_v31 }
  0x93   :  { %vm86_vm3 = vcmp.ge.f32.partialorder %v79_v32, 0.0  ;;  %v90_v33 = vmul.f32 0.2, %v79_v32 }
  0x95   :  { %v94_v35 = vsel %vm86_vm3, %v79_v32, %v90_v33 }
  0x96   :  { %v102_v36 = vadd.f32 %v98_v34, %v94_v35 }
  0x98   :  { %v81_v38 = vpop.f32.mrf.mxu3  ;;  %v130_v39 = vmul.f32 %v121_v37, %v102_v36 }
  0x99   :  { %v82_v40 = vadd.f32 %v267_v14, %v81_v38 }
  0x9a   :  { %252 = vmatmul.msk.f32.gmra.mxu1 %vm42_vm0, %v130_v39 }
  0x9b   :  { %vm87_vm4 = vcmp.ge.f32.partialorder %v82_v40, 0.0  ;;  %v91_v41 = vmul.f32 0.2, %v82_v40 }
  0x9d   :  { %v95_v43 = vsel %vm87_vm4, %v82_v40, %v91_v41 }
  0x9e   :  { %v103_v44 = vadd.f32 %v99_v42, %v95_v43 }
  0xa0   :  { %v131_v45 = vmul.f32 %v126_v13, %v103_v44 }
  0xa2   :  { %253 = vmatmul.msk.f32.gmra.mxu1 %vm42_vm0, %v131_v45 }
 0x10a   :  { %v167_v49 = vpop.f32.mrf.mxu0 }
 0x10b   :  { %v168_v50 = vadd.f32 %v268_v48, %v167_v49 }
 0x10d   :  { %vm179_vm5 = vcmp.ge.f32.partialorder %v168_v50, 0.0  ;;  %v183_v51 = vmul.f32 0.2, %v168_v50 }
 0x10f   :  { %v187_v52 = vsel %vm179_vm5, %v168_v50, %v183_v51  ;;  %v170_v53 = vpop.f32.mrf.mxu1 }
 0x110   :  { %254 = vmatmul.msk.f32.vlgmr.msra.gmra.mxu0 %vm42_vm0, %v187_v52  ;;  %v171_v54 = vadd.f32 %v268_v48, %v170_v53 }
 0x112   :  { %v184_v55 = vmul.f32 0.2, %v171_v54  ;;  %vm180_vm6 = vcmp.ge.f32.partialorder %v171_v54, 0.0 }
 0x114   :  { %v188_v56 = vsel %vm180_vm6, %v171_v54, %v184_v55 }
 0x115   :  { %255 = vmatmul.msk.f32.vlgmr.msra.gmra.mxu2 %vm42_vm0, %v188_v56 }
 0x117   :  { %v173_v57 = vpop.f32.mrf.mxu1 }
 0x118   :  { %v174_v58 = vadd.f32 %v268_v48, %v173_v57 }
 0x11a   :  { %v185_v59 = vmul.f32 0.2, %v174_v58  ;;  %vm181_vm7 = vcmp.ge.f32.partialorder %v174_v58, 0.0 }
 0x11c   :  { %v189_v60 = vsel %vm181_vm7, %v174_v58, %v185_v59 }
 0x11d   :  { %256 = vmatmul.msk.f32.gmra.mxu2 %vm42_vm0, %v189_v60 }
 0x11f   :  { %v176_v61 = vpop.f32.mrf.mxu1 }
 0x120   :  { %v177_v62 = vadd.f32 %v268_v48, %v176_v61 }
 0x122   :  { %v186_v63 = vmul.f32 0.2, %v177_v62  ;;  %vm182_vm8 = vcmp.ge.f32.partialorder %v177_v62, 0.0 }
 0x124   :  { %v190_v0 = vsel %vm182_vm8, %v177_v62, %v186_v63 }
 0x125   :  { %257 = vmatmul.msk.f32.gmra.mxu2 %vm42_vm0, %v190_v0 }
 0x18d   :  { %v226_v2 = vpop.f32.mrf.mxu0 }
 0x18e   :  { %v227_v3 = vadd.f32 %v269_v1, %v226_v2 }
 0x190   :  { %238 = vst.msk [vmem:[%s421_s9] sm:$0xff] %vm42_vm0, %v227_v3 }
 0x198   :  { %v229_v4 = vpop.f32.mrf.mxu2 }
 0x199   :  { %v230_v5 = vadd.f32 %v269_v1, %v229_v4 }
 0x19b   :  { %239 = vst.msk [vmem:[%s421_s9 + $0x8] sm:$0xff] %vm42_vm0, %v230_v5 }
 0x1a0   :  { %v232_v6 = vpop.f32.mrf.mxu2 }
 0x1a1   :  { %v233_v7 = vadd.f32 %v269_v1, %v232_v6 }
 0x1a3   :  { %240 = vst.msk [vmem:[%s421_s9 + $0x10] sm:$0xff] %vm42_vm0, %v233_v7 }
 0x1a8   :  { %v235_v8 = vpop.f32.mrf.mxu2 }
 0x1a9   :  { %v236_v9 = vadd.f32 %v269_v1, %v235_v8 }
 0x1ab   :  { %241 = vst.msk [vmem:[%s421_s9 + $0x18] sm:$0xff] %vm42_vm0, %v236_v9 }

// kernel: plsnet_forward.5
= control target key start
LH: loop header
LB: loop body
LE: loop exit
PB: predicated region body
PF: predicated region fallthrough
CT: control target
= control target key end

     0   :  { %vm28_vm0 = vcmask 261120   ;;  %vm70_vm1 = vcmask 195584   ;;  %s395_s1 = inlined_call_operand.vmem [shape: f32[32,24], index: 1, kind: input, shape index: {}]   ;;  %s396_s2 = inlined_call_operand.vmem [shape: f32[1,24], index: 2, kind: input, shape index: {}]   ;;  %s397_s0 = inlined_call_operand.vmem [shape: f32[32,32], index: 0, kind: input, shape index: {}]   ;;  %s398_s3 = inlined_call_operand.vmem [shape: f32[2,16,16], index: 3, kind: output, shape index: {0}]   ;;  %s399_s4 = inlined_call_operand.vmem [shape: f32[32,1], index: 4, kind: output, shape index: {1}]  }
   0x1   :  { %v23_v0 = vld [vmem:[%s395_s1 + $0x18] sm:$0xff]  ;;  %v22_v1 = vld [vmem:[%s395_s1 + $0x10] sm:$0xff]  ;;  %v21_v2 = vld [vmem:[%s395_s1 + $0x8] sm:$0xff] }
   0x2   :  { %53 = vmatpush.msra.mxu0 %v23_v0  ;;  %270 = vmatpush.msra.mxu3 %v23_v0  ;;  %v20_v3 = vld [vmem:[%s395_s1] sm:$0xff]  ;;  %v18_v5 = vld [vmem:[%s397_s0 + $0x10] sm:$0xff]  ;;  %v17_v6 = vld [vmem:[%s397_s0 + $0x8] sm:$0xff] }
   0x3   :  { %v16_v4 = vld [vmem:[%s397_s0] sm:$0xff]  ;;  %v19_v7 = vld [vmem:[%s397_s0 + $0x18] sm:$0xff] }
   0x4   :  { %54 = vmatpush.msra.mxu0 %v22_v1  ;;  %271 = vmatpush.msra.mxu3 %v22_v1  ;;  %v274_v10 = vld [vmem:[%s396_s2] ss:$0 sm:$0xff] }
   0x6   :  { %55 = vmatpush.msra.mxu0 %v21_v2  ;;  %272 = vmatpush.msra.mxu3 %v21_v2 }
   0x8   :  { %56 = vmatpush.msra.mxu0 %v20_v3  ;;  %273 = vmatpush.msra.mxu3 %v20_v3 }
   0x9   :  { %256 = vmatmul.msk.f32.vlgmr.msra.gmra.mxu0 %vm28_vm0, %v16_v4  ;;  %258 = vmatmul.msk.f32.vlgmr.msra.gmra.mxu3 %vm28_vm0, %v18_v5 }
  0x11   :  { %257 = vmatmul.msk.f32.gmra.mxu0 %vm28_vm0, %v17_v6  ;;  %259 = vmatmul.msk.f32.gmra.mxu3 %vm28_vm0, %v19_v7 }
  0x86   :  { %v58_v8 = vpop.f32.mrf.mxu0 }
  0x87   :  { %v59_v15 = vadd.f32 %v274_v10, %v58_v8 }
  0x89   :  { %v71_v18 = vsel %vm70_vm1, %v59_v15, -inf }
  0x8c   :  { %v64_v9 = vpop.f32.mrf.mxu3 }
  0x8d   :  { %v65_v19 = vadd.f32 %v274_v10, %v64_v9 }
  0x8e   :  { %v61_v11 = vpop.f32.mrf.mxu0 }
  0x8f   :  { %v62_v12 = vadd.f32 %v274_v10, %v61_v11  ;;  %v77_v20 = vsel %vm70_vm1, %v65_v19, -inf }
  0x91   :  { %v74_v13 = vsel %vm70_vm1, %v62_v12, -inf }
  0x92   :  { %75 = vmax.xlane.f32.xlu1 %v74_v13 }
  0x94   :  { %v67_v14 = vpop.f32.mrf.mxu3 }
  0x95   :  { %v68_v16 = vadd.f32 %v274_v10, %v67_v14 }
  0x97   :  { %v80_v17 = vsel %vm70_vm1, %v68_v16, -inf }
  0x98   :  { %81 = vmax.xlane.f32.xlu0 %v80_v17 }
  0x9a   :  { %72 = vmax.xlane.f32.xlu1 %v71_v18 }
  0xa0   :  { %78 = vmax.xlane.f32.xlu0 %v77_v20 }
 0x105   :  { %v76_v21 = vpop.xlane.xlu1 %75 }
 0x106   :  { %v84_v22 = vsub.f32 %v62_v12, %v76_v21 }
 0x108   :  { %v89_v23 = vmul.f32 1.442695, %v84_v22 }
 0x10a   :  { %275 = vpow2.f32 %v89_v23 }
 0x10b   :  { %v82_v24 = vpop.xlane.xlu0 %81 }
 0x10c   :  { %v86_v25 = vsub.f32 %v68_v16, %v82_v24 }
 0x10d   :  { %v73_v26 = vpop.xlane.xlu1 %72 }
 0x10e   :  { %v93_v27 = vmul.f32 1.442695, %v86_v25  ;;  %v83_v28 = vsub.f32 %v59_v15, %v73_v26 }
 0x110   :  { %v276_v29 = vpop.eup %275  ;;  %277 = vpow2.f32 %v93_v27  ;;  %v87_v30 = vmul.f32 1.442695, %v83_v28 }
 0x111   :  { %v98_v31 = vsel %vm70_vm1, %v276_v29, 0.0 }
 0x112   :  { %279 = vpow2.f32 %v87_v30  ;;  %99 = vadd.xlane.f32.xlu0 %v98_v31 }
 0x113   :  { %v79_v32 = vpop.xlane.xlu0 %78 }
 0x114   :  { %v85_v33 = vsub.f32 %v65_v19, %v79_v32 }
 0x116   :  { %v348_v34 = vpop.eup %277  ;;  %v91_v35 = vmul.f32 1.442695, %v85_v33 }
 0x117   :  { %v104_v36 = vsel %vm70_vm1, %v348_v34, 0.0 }
 0x118   :  { %v352_v37 = vpop.eup %279  ;;  %281 = vpow2.f32 %v91_v35  ;;  %105 = vadd.xlane.f32.xlu2 %v104_v36 }
 0x119   :  { %v95_v38 = vsel %vm70_vm1, %v352_v37, 0.0 }
 0x11a   :  { %96 = vadd.xlane.f32.xlu1 %v95_v38 }
 0x11e   :  { %v356_v39 = vpop.eup %281 }
 0x11f   :  { %v101_v40 = vsel %vm70_vm1, %v356_v39, 0.0 }
 0x120   :  { %102 = vadd.xlane.f32.xlu2 %v101_v40 }
 0x185   :  { %v100_v41 = vpop.xlane.xlu0 %99 }
 0x186   :  { %283 = vrcp.f32 %v100_v41  ;;  %v133_v47 = vand.u32 2147483648, %v100_v41  ;;  %v131_v49 = vand.u32 2147483647, %v100_v41  ;;  %vm127_vm3 = vweird.f32 %v100_v41 }
 0x188   :  { %v134_v55 = vor.u32 1.1754944e-38, %v133_v47  ;;  %vm132_vm5 = vcmp.eq.f32.partialorder %v131_v49, 8.507059e+37 }
 0x18b   :  { %v106_v42 = vpop.xlane.xlu2 %105 }
 0x18c   :  { %v284_v43 = vpop.eup %283  ;;  %285 = vrcp.f32 %v106_v42  ;;  %v161_v60 = vand.u32 2147483647, %v106_v42  ;;  %v163_v61 = vand.u32 2147483648, %v106_v42  ;;  %vm157_vm7 = vweird.f32 %v106_v42 }
 0x18d   :  { %v123_v44 = vmul.f32 %v284_v43, %v100_v41  ;;  %v97_v45 = vpop.xlane.xlu1 %96  ;;  %vm128_vm2 = vweird.f32 %v284_v43 }
 0x18e   :  { %287 = vrcp.f32 %v97_v45  ;;  %vm129_vm4 = vmor %vm127_vm3, %vm128_vm2  ;;  %v118_v1 = vand.u32 2147483648, %v97_v45  ;;  %v116_v4 = vand.u32 2147483647, %v97_v45  ;;  %vm112_vm9 = vweird.f32 %v97_v45 }
 0x18f   :  { %v124_v46 = vsub.f32 1.0, %v123_v44  ;;  %v164_v6 = vor.u32 1.1754944e-38, %v163_v61  ;;  %vm162_vm11 = vcmp.eq.f32.partialorder %v161_v60, 8.507059e+37  ;;  %vm196_vm3 = vcmask 130048  }
 0x190   :  { %v119_v10 = vor.u32 1.1754944e-38, %v118_v1  ;;  %vm117_vm13 = vcmp.eq.f32.partialorder %v116_v4, 8.507059e+37 }
 0x191   :  { %v125_v48 = vmul.f32 %v284_v43, %v124_v46 }
 0x192   :  { %v286_v50 = vpop.eup %285 }
 0x193   :  { %v153_v51 = vmul.f32 %v286_v50, %v106_v42  ;;  %v103_v52 = vpop.xlane.xlu2 %102  ;;  %v126_v53 = vadd.f32 %v284_v43, %v125_v48  ;;  %vm158_vm6 = vweird.f32 %v286_v50 }
 0x194   :  { %v288_v54 = vpop.eup %287  ;;  %289 = vrcp.f32 %v103_v52  ;;  %vm159_vm10 = vmor %vm157_vm7, %vm158_vm6  ;;  %v148_v15 = vand.u32 2147483648, %v103_v52  ;;  %v146_v19 = vand.u32 2147483647, %v103_v52  ;;  %vm142_vm15 = vweird.f32 %v103_v52 }
 0x195   :  { %v154_v56 = vsub.f32 1.0, %v153_v51  ;;  %v108_v57 = vmul.f32 %v288_v54, %v97_v45  ;;  %v130_v58 = vsel %vm129_vm4, %v284_v43, %v126_v53  ;;  %vm113_vm8 = vweird.f32 %v288_v54 }
 0x196   :  { %v135_v59 = vsel %vm132_vm5, %v134_v55, %v130_v58  ;;  %vm114_vm12 = vmor %vm112_vm9, %vm113_vm8  ;;  %v149_v21 = vor.u32 1.1754944e-38, %v148_v15  ;;  %vm147_vm2 = vcmp.eq.f32.partialorder %v146_v19, 8.507059e+37 }
 0x197   :  { %v155_v62 = vmul.f32 %v286_v50, %v154_v56  ;;  %v109_v63 = vsub.f32 1.0, %v108_v57  ;;  %v136_v0 = vmul.f32 %v276_v29, %v135_v59 }
 0x199   :  { %v110_v2 = vmul.f32 %v288_v54, %v109_v63  ;;  %260 = vmatpush.xpose.msk.msra.mxu1 %vm70_vm1, %v136_v0  ;;  %v156_v3 = vadd.f32 %v286_v50, %v155_v62 }
 0x19a   :  { %v290_v5 = vpop.eup %289 }
 0x19b   :  { %v138_v7 = vmul.f32 %v290_v5, %v103_v52  ;;  %v160_v8 = vsel %vm159_vm10, %v286_v50, %v156_v3  ;;  %v111_v9 = vadd.f32 %v288_v54, %v110_v2  ;;  %vm143_vm14 = vweird.f32 %v290_v5 }
 0x19c   :  { %v165_v11 = vsel %vm162_vm11, %v164_v6, %v160_v8  ;;  %vm144_vm0 = vmor %vm142_vm15, %vm143_vm14 }
 0x19d   :  { %v139_v12 = vsub.f32 1.0, %v138_v7  ;;  %v166_v13 = vmul.f32 %v348_v34, %v165_v11  ;;  %v115_v14 = vsel %vm114_vm12, %v288_v54, %v111_v9 }
 0x19e   :  { %v120_v16 = vsel %vm117_vm13, %v119_v10, %v115_v14 }
 0x19f   :  { %v140_v17 = vmul.f32 %v290_v5, %v139_v12  ;;  %264 = vmatpush.xpose.msk.msra.mxu2 %vm70_vm1, %v166_v13  ;;  %v121_v18 = vmul.f32 %v352_v37, %v120_v16 }
 0x1a1   :  { %261 = vmatpush.xpose.msk.msra.mxu1 %vm70_vm1, %v121_v18  ;;  %v141_v20 = vadd.f32 %v290_v5, %v140_v17 }
 0x1a3   :  { %v145_v22 = vsel %vm144_vm0, %v290_v5, %v141_v20 }
 0x1a4   :  { %262 = vmatmul.msk.f32.vlgmr.msra.gmra.mxu1 %vm70_vm1, %v121_v18  ;;  %v150_v23 = vsel %vm147_vm2, %v149_v21, %v145_v22 }
 0x1a5   :  { %v151_v24 = vmul.f32 %v356_v39, %v150_v23 }
 0x1a7   :  { %265 = vmatpush.xpose.msk.msra.mxu2 %vm70_vm1, %v151_v24 }
 0x1aa   :  { %266 = vmatmul.msk.f32.vlgmr.msra.gmra.mxu2 %vm70_vm1, %v151_v24 }
 0x1ac   :  { %263 = vmatmul.msk.f32.gmra.mxu1 %vm70_vm1, %v136_v0 }
 0x1b2   :  { %267 = vmatmul.msk.f32.gmra.mxu2 %vm70_vm1, %v166_v13  ;;  %vm205_vm1 = vcmask 7168  }
 0x221   :  { %v190_v25 = vpop.f32.mrf.mxu1 }
 0x222   :  { %197 = vst.msk [vmem:[%s398_s3] sm:$0xff] %vm196_vm3, %v190_v25  ;;  %v199_v26 = vsel %vm196_vm3, %v190_v25, 0.0 }
 0x223   :  { %200 = vadd.xlane.f32.xlu2 %v199_v26 }
 0x229   :  { %v193_v27 = vpop.f32.mrf.mxu1 }
 0x22a   :  { %198 = vst.msk [vmem:[%s398_s3 + $0x8] sm:$0xff] %vm196_vm3, %v193_v27  ;;  %v202_v28 = vsel %vm196_vm3, %v193_v27, 0.0 }
 0x22b   :  { %203 = vadd.xlane.f32.xlu0 %v202_v28 }
 0x22d   :  { %v231_v29 = vpop.f32.mrf.mxu2 }
 0x22e   :  { %268 = vst.msk [vmem:[%s398_s3 + $0x10] sm:$0xff] %vm196_vm3, %v231_v29  ;;  %v240_v30 = vsel %vm196_vm3, %v231_v29, 0.0 }
 0x22f   :  { %241 = vadd.xlane.f32.xlu1 %v240_v30 }
 0x235   :  { %v234_v31 = vpop.f32.mrf.mxu2 }
 0x236   :  { %269 = vst.msk [vmem:[%s398_s3 + $0x18] sm:$0xff] %vm196_vm3, %v234_v31  ;;  %v243_v32 = vsel %vm196_vm3, %v234_v31, 0.0 }
 0x237   :  { %244 = vadd.xlane.f32.xlu2 %v243_v32 }
 0x296   :  { %v201_v33 = vpop.xlane.xlu2 %200 }
 0x297   :  { %206 = vst.msk [vmem:[%s399_s4] sm:$0xff] %vm205_vm1, %v201_v33 }
 0x29e   :  { %v204_v34 = vpop.xlane.xlu0 %203 }
 0x29f   :  { %207 = vst.msk [vmem:[%s399_s4 + $0x8] sm:$0xff] %vm205_vm1, %v204_v34 }
 0x2a2   :  { %v242_v35 = vpop.xlane.xlu1 %241 }
 0x2a3   :  { %246 = vst.msk [vmem:[%s399_s4 + $0x10] sm:$0xff] %vm205_vm1, %v242_v35 }
 0x2aa   :  { %v245_v36 = vpop.xlane.xlu2 %244 }
 0x2ab   :  { %247 = vst.msk [vmem:[%s399_s4 + $0x18] sm:$0xff] %vm205_vm1, %v245_v36 }

// kernel: plsnet_forward.7
= control target key start
LH: loop header
LB: loop body
LE: loop exit
PB: predicated region body
PF: predicated region fallthrough
CT: control target
= control target key end

     0   :  { %v155_v0 = vmov 0   ;;  %vm77_vm0 = vcmask 130048   ;;  %s250_s3 = inlined_call_operand.vmem [shape: f32[32,1], index: 3, kind: input, shape index: {}]   ;;  %s251_s4 = inlined_call_operand.vmem [shape: f32[16,16], index: 4, kind: input, shape index: {}]   ;;  %s252_s1 = inlined_call_operand.vmem [shape: f32[1,16], index: 1, kind: input, shape index: {}]   ;;  %s253_s2 = inlined_call_operand.vmem [shape: f32[1,16], index: 2, kind: input, shape index: {}]   ;;  %s254_s5 = inlined_call_operand.vmem [shape: f32[1,16], index: 5, kind: input, shape index: {}]   ;;  %s255_s0 = inlined_call_operand.vmem [shape: f32[32,16], index: 0, kind: input, shape index: {}]   ;;  %s256_s6 = inlined_call_operand.vmem [shape: f32[32,16], index: 6, kind: output, shape index: {}]  }
   0x1   :  { %151 = vset.pattern.permute.xlu1 %v155_v0  ;;  %150 = vset.pattern.permute.xlu0 %v155_v0  ;;  %v45_v1 = vld [vmem:[%s250_s3 + $0x10] sm:$0xff]  ;;  %v43_v2 = vld [vmem:[%s250_s3] sm:$0xff]  ;;  %v72_v3 = vld [vmem:[%s251_s4 + $0x8] sm:$0xff] }
   0x2   :  { %59 = vperm.xlu0 %150, %v45_v1   ;;  %49 = vperm.xlu1 %151, %v43_v2   ;;  %v46_v4 = vld [vmem:[%s250_s3 + $0x18] sm:$0xff]  ;;  %v44_v5 = vld [vmem:[%s250_s3 + $0x8] sm:$0xff]  ;;  %v71_v6 = vld [vmem:[%s251_s4] sm:$0xff] }
   0x3   :  { %144 = vmatpush.msra.mxu2 %v72_v3  ;;  %104 = vmatpush.msra.mxu0 %v72_v3  ;;  %v152_v7 = vld [vmem:[%s252_s1] ss:$0 sm:$0xff]  ;;  %v25_v8 = vld [vmem:[%s255_s0 + $0x10] sm:$0xff]  ;;  %v26_v15 = vld [vmem:[%s255_s0 + $0x18] sm:$0xff] }
   0x4   :  { %143 = vmatpush.msra.mxu1 %v72_v3  ;;  %145 = vmatpush.msra.mxu3 %v72_v3  ;;  %v23_v9 = vld [vmem:[%s255_s0] sm:$0xff]  ;;  %v33_v10 = vmul.f32 %v152_v7, %v25_v8  ;;  %v24_v16 = vld [vmem:[%s255_s0 + $0x8] sm:$0xff]  ;;  %v34_v21 = vmul.f32 %v152_v7, %v26_v15 }
   0x5   :  { %147 = vmatpush.msra.mxu2 %v71_v6  ;;  %105 = vmatpush.msra.mxu0 %v71_v6  ;;  %v153_v11 = vld [vmem:[%s253_s2] ss:$0 sm:$0xff]  ;;  %v31_v12 = vmul.f32 %v152_v7, %v23_v9  ;;  %v32_v22 = vmul.f32 %v152_v7, %v24_v16 }
   0x6   :  { %146 = vmatpush.msra.mxu1 %v71_v6  ;;  %148 = vmatpush.msra.mxu3 %v71_v6  ;;  %v41_v13 = vadd.f32 %v153_v11, %v33_v10  ;;  %v42_v23 = vadd.f32 %v153_v11, %v34_v21  ;;  %v154_v29 = vld [vmem:[%s254_s5] ss:$0 sm:$0xff] }
   0x7   :  { %v39_v14 = vadd.f32 %v153_v11, %v31_v12  ;;  %v40_v24 = vadd.f32 %v153_v11, %v32_v22 }
   0xa   :  { %64 = vperm.xlu0 %150, %v46_v4   ;;  %54 = vperm.xlu1 %151, %v44_v5  }
  0x74   :  { %v60_v17 = vpop.permute.xlu0 %59  ;;  %v50_v18 = vpop.permute.xlu1 %49 }
  0x75   :  { %v69_v19 = vmul.f32 %v60_v17, %v41_v13  ;;  %v67_v20 = vmul.f32 %v50_v18, %v39_v14 }
  0x77   :  { %141 = vmatmul.msk.f32.vlgmr.msra.gmra.mxu2 %vm77_vm0, %v69_v19  ;;  %139 = vmatmul.msk.f32.vlgmr.msra.gmra.mxu0 %vm77_vm0, %v67_v20 }
  0x7c   :  { %v65_v25 = vpop.permute.xlu0 %64  ;;  %v55_v26 = vpop.permute.xlu1 %54 }
  0x7d   :  { %v70_v27 = vmul.f32 %v65_v25, %v42_v23  ;;  %v68_v28 = vmul.f32 %v55_v26, %v40_v24 }
  0x7f   :  { %140 = vmatmul.msk.f32.vlgmr.msra.gmra.mxu1 %vm77_vm0, %v68_v28  ;;  %142 = vmatmul.msk.f32.vlgmr.msra.gmra.mxu3 %vm77_vm0, %v70_v27 }
  0xf4   :  { %v107_v30 = vpop.f32.mrf.mxu0 }
  0xf5   :  { %v108_v31 = vadd.f32 %v154_v29, %v107_v30 }
  0xf7   :  { %vm119_vm1 = vcmp.ge.f32.partialorder %v108_v31, 0.0  ;;  %v123_v32 = vmul.f32 0.2, %v108_v31 }
  0xf9   :  { %v127_v33 = vsel %vm119_vm1, %v108_v31, %v123_v32 }
  0xfa   :  { %131 = vst.msk [vmem:[%s256_s6] sm:$0xff] %vm77_vm0, %v127_v33  ;;  %v113_v34 = vpop.f32.mrf.mxu2 }
  0xfb   :  { %v114_v35 = vadd.f32 %v154_v29, %v113_v34 }
  0xfc   :  { %v110_v36 = vpop.f32.mrf.mxu1 }
  0xfd   :  { %vm121_vm2 = vcmp.ge.f32.partialorder %v114_v35, 0.0  ;;  %v125_v37 = vmul.f32 0.2, %v114_v35  ;;  %v111_v38 = vadd.f32 %v154_v29, %v110_v36 }
  0xff   :  { %v129_v39 = vsel %vm121_vm2, %v114_v35, %v125_v37  ;;  %vm120_vm3 = vcmp.ge.f32.partialorder %v111_v38, 0.0  ;;  %v124_v40 = vmul.f32 0.2, %v111_v38 }
 0x100   :  { %133 = vst.msk [vmem:[%s256_s6 + $0x10] sm:$0xff] %vm77_vm0, %v129_v39 }
 0x101   :  { %v128_v41 = vsel %vm120_vm3, %v111_v38, %v124_v40 }
 0x102   :  { %132 = vst.msk [vmem:[%s256_s6 + $0x8] sm:$0xff] %vm77_vm0, %v128_v41  ;;  %v116_v42 = vpop.f32.mrf.mxu3 }
 0x103   :  { %v117_v43 = vadd.f32 %v154_v29, %v116_v42 }
 0x105   :  { %vm122_vm4 = vcmp.ge.f32.partialorder %v117_v43, 0.0  ;;  %v126_v44 = vmul.f32 0.2, %v117_v43 }
 0x107   :  { %v130_v45 = vsel %vm122_vm4, %v117_v43, %v126_v44 }
 0x108   :  { %134 = vst.msk [vmem:[%s256_s6 + $0x18] sm:$0xff] %vm77_vm0, %v130_v45 }

// kernel: plsnet_forward.8
= control target key start
LH: loop header
LB: loop body
LE: loop exit
PB: predicated region body
PF: predicated region fallthrough
CT: control target
= control target key end

     0   :  { %v245_v0 = vmov 0   ;;  %vm83_vm0 = vcmask 130048   ;;  %vm149_vm2 = vcmask 523264   ;;  %vm203_vm7 = vcmask 64512   ;;  %s381_s3 = inlined_call_operand.vmem [shape: f32[32,1], index: 3, kind: input, shape index: {}]   ;;  %s382_s4 = inlined_call_operand.vmem [shape: f32[16,64], index: 4, kind: input, shape index: {}]   ;;  %s383_s1 = inlined_call_operand.vmem [shape: f32[1,16], index: 1, kind: input, shape index: {}]   ;;  %s384_s2 = inlined_call_operand.vmem [shape: f32[1,16], index: 2, kind: input, shape index: {}]   ;;  %s385_s5 = inlined_call_operand.vmem [shape: f32[1,64], index: 5, kind: input, shape index: {}]   ;;  %s386_s6 = inlined_call_operand.vmem [shape: f32[64,8], index: 6, kind: input, shape index: {}]   ;;  %s387_s0 = inlined_call_operand.vmem [shape: f32[32,16], index: 0, kind: input, shape index: {}]   ;;  %s388_s7 = inlined_call_operand.vmem [shape: f32[1,8], index: 7, kind: input, shape index: {}]   ;;  %s389_s8 = inlined_call_operand.vmem [shape: f32[32,8], index: 8, kind: output, shape index: {}]  }
   0x1   :  { %239 = vset.pattern.permute.xlu0 %v245_v0  ;;  %v50_v1 = vld [vmem:[%s381_s3 + $0x8] sm:$0xff]  ;;  %240 = vset.pattern.permute.xlu1 %v245_v0  ;;  %v52_v2 = vld [vmem:[%s381_s3 + $0x18] sm:$0xff]  ;;  %v51_v4 = vld [vmem:[%s381_s3 + $0x10] sm:$0xff] }
   0x2   :  { %60 = vperm.xlu0 %239, %v50_v1   ;;  %70 = vperm.xlu1 %240, %v52_v2   ;;  %v78_v3 = vld [vmem:[%s382_s4 + $0x8] sm:$0xff]  ;;  %v49_v5 = vld [vmem:[%s381_s3] sm:$0xff]  ;;  %v144_v7 = vld [vmem:[%s386_s6 + $0x38] sm:$0xff] }
   0x3   :  { %220 = vmatpush.msra.mxu3 %v78_v3  ;;  %110 = vmatpush.msra.mxu0 %v78_v3  ;;  %v77_v6 = vld [vmem:[%s382_s4] sm:$0xff]  ;;  %v143_v8 = vld [vmem:[%s386_s6 + $0x30] sm:$0xff]  ;;  %v142_v10 = vld [vmem:[%s386_s6 + $0x28] sm:$0xff] }
   0x4   :  { %222 = vmatpush.msra.mxu1 %v144_v7  ;;  %v241_v9 = vld [vmem:[%s383_s1] ss:$0 sm:$0xff]  ;;  %223 = vmatpush.msra.mxu2 %v144_v7  ;;  %v30_v11 = vld [vmem:[%s387_s0 + $0x8] sm:$0xff]  ;;  %v140_v15 = vld [vmem:[%s386_s6 + $0x18] sm:$0xff] }
   0x5   :  { %221 = vmatpush.msra.mxu3 %v77_v6  ;;  %111 = vmatpush.msra.mxu0 %v77_v6  ;;  %v141_v12 = vld [vmem:[%s386_s6 + $0x20] sm:$0xff]  ;;  %v38_v13 = vmul.f32 %v241_v9, %v30_v11  ;;  %v31_v17 = vld [vmem:[%s387_s0 + $0x10] sm:$0xff]  ;;  %v32_v24 = vld [vmem:[%s387_s0 + $0x18] sm:$0xff] }
   0x6   :  { %224 = vmatpush.msra.mxu1 %v143_v8  ;;  %225 = vmatpush.msra.mxu2 %v143_v8  ;;  %v242_v14 = vld [vmem:[%s384_s2] ss:$0 sm:$0xff]  ;;  %v39_v22 = vmul.f32 %v241_v9, %v31_v17  ;;  %v40_v27 = vmul.f32 %v241_v9, %v32_v24  ;;  %v139_v34 = vld [vmem:[%s386_s6 + $0x10] sm:$0xff]  ;;  %v138_v35 = vld [vmem:[%s386_s6 + $0x8] sm:$0xff] }
   0x7   :  { %170 = vmatpush.msrb.mxu0 %v144_v7  ;;  %v46_v16 = vadd.f32 %v242_v14, %v38_v13  ;;  %v29_v18 = vld [vmem:[%s387_s0] sm:$0xff] }
   0x8   :  { %226 = vmatpush.msra.mxu1 %v142_v10  ;;  %227 = vmatpush.msra.mxu2 %v142_v10  ;;  %v37_v23 = vmul.f32 %v241_v9, %v29_v18  ;;  %v47_v25 = vadd.f32 %v242_v14, %v39_v22  ;;  %v48_v32 = vadd.f32 %v242_v14, %v40_v27  ;;  %v137_v36 = vld [vmem:[%s386_s6] sm:$0xff] }
   0x9   :  { %171 = vmatpush.msrb.mxu0 %v143_v8  ;;  %v243_v37 = vld [vmem:[%s385_s5] ss:$0 sm:$0xff] }
   0xa   :  { %65 = vperm.xlu0 %239, %v51_v4   ;;  %55 = vperm.xlu1 %240, %v49_v5   ;;  %v45_v26 = vadd.f32 %v242_v14, %v37_v23  ;;  %v244_v54 = vld [vmem:[%s388_s7] ss:$0 sm:$0xff] }
   0xb   :  { %172 = vmatpush.msrb.mxu0 %v142_v10  ;;  %228 = vmatpush.msra.mxu1 %v141_v12 }
   0xc   :  { %229 = vmatpush.msra.mxu2 %v141_v12 }
   0xd   :  { %173 = vmatpush.msrb.mxu0 %v141_v12  ;;  %230 = vmatpush.msra.mxu1 %v140_v15 }
   0xe   :  { %231 = vmatpush.msra.mxu2 %v140_v15 }
   0xf   :  { %174 = vmatpush.msrb.mxu0 %v140_v15  ;;  %232 = vmatpush.msra.mxu1 %v139_v34 }
  0x10   :  { %233 = vmatpush.msra.mxu2 %v139_v34 }
  0x11   :  { %175 = vmatpush.msrb.mxu0 %v139_v34  ;;  %234 = vmatpush.msra.mxu1 %v138_v35 }
  0x12   :  { %235 = vmatpush.msra.mxu2 %v138_v35 }
  0x13   :  { %176 = vmatpush.msrb.mxu0 %v138_v35  ;;  %236 = vmatpush.msra.mxu1 %v137_v36 }
  0x14   :  { %237 = vmatpush.msra.mxu2 %v137_v36 }
  0x15   :  { %177 = vmatpush.msrb.mxu0 %v137_v36 }
  0x74   :  { %v61_v19 = vpop.permute.xlu0 %60  ;;  %v71_v20 = vpop.permute.xlu1 %70 }
  0x75   :  { %v74_v21 = vmul.f32 %v61_v19, %v46_v16  ;;  %v76_v33 = vmul.f32 %v71_v20, %v48_v32 }
  0x77   :  { %213 = vmatmul.msk.f32.vlgmr.msra.gmra.mxu3 %vm83_vm0, %v74_v21 }
  0x7c   :  { %v66_v28 = vpop.permute.xlu0 %65  ;;  %v56_v29 = vpop.permute.xlu1 %55 }
  0x7d   :  { %v75_v30 = vmul.f32 %v66_v28, %v47_v25  ;;  %v73_v31 = vmul.f32 %v56_v29, %v45_v26 }
  0x7f   :  { %214 = vmatmul.msk.f32.gmra.mxu3 %vm83_vm0, %v75_v30  ;;  %212 = vmatmul.msk.f32.vlgmr.msra.gmra.mxu0 %vm83_vm0, %v73_v31 }
  0x87   :  { %215 = vmatmul.msk.f32.gmra.mxu3 %vm83_vm0, %v76_v33 }
  0xfa   :  { %v116_v38 = vpop.f32.mrf.mxu3 }
  0xfb   :  { %v117_v39 = vadd.f32 %v243_v37, %v116_v38 }
  0xfc   :  { %v113_v40 = vpop.f32.mrf.mxu0 }
  0xfd   :  { %v130_v41 = vmul.f32 0.2, %v117_v39  ;;  %v114_v42 = vadd.f32 %v243_v37, %v113_v40  ;;  %vm126_vm1 = vcmp.ge.f32.partialorder %v117_v39, 0.0 }
  0xff   :  { %vm125_vm3 = vcmp.ge.f32.partialorder %v114_v42, 0.0  ;;  %v129_v43 = vmul.f32 0.2, %v114_v42  ;;  %v134_v44 = vsel %vm126_vm1, %v117_v39, %v130_v41 }
 0x100   :  { %217 = vmatmul.msk.f32.vlgmr.msra.gmra.mxu1 %vm149_vm2, %v134_v44 }
 0x101   :  { %v133_v45 = vsel %vm125_vm3, %v114_v42, %v129_v43 }
 0x102   :  { %v119_v46 = vpop.f32.mrf.mxu3  ;;  %216 = vmatmul.msk.f32.vlgmr.msrb.gmra.mxu0 %vm149_vm2, %v133_v45 }
 0x103   :  { %v120_v47 = vadd.f32 %v243_v37, %v119_v46 }
 0x105   :  { %v131_v48 = vmul.f32 0.2, %v120_v47  ;;  %vm127_vm4 = vcmp.ge.f32.partialorder %v120_v47, 0.0 }
 0x107   :  { %v135_v49 = vsel %vm127_vm4, %v120_v47, %v131_v48 }
 0x108   :  { %218 = vmatmul.msk.f32.vlgmr.msra.gmra.mxu2 %vm149_vm2, %v135_v49 }
 0x10a   :  { %v122_v50 = vpop.f32.mrf.mxu3 }
 0x10b   :  { %v123_v51 = vadd.f32 %v243_v37, %v122_v50 }
 0x10d   :  { %v132_v52 = vmul.f32 0.2, %v123_v51  ;;  %vm128_vm5 = vcmp.ge.f32.partialorder %v123_v51, 0.0 }
 0x10f   :  { %v136_v53 = vsel %vm128_vm5, %v123_v51, %v132_v52 }
 0x110   :  { %219 = vmatmul.msk.f32.gmra.mxu2 %vm149_vm2, %v136_v53 }
 0x17d   :  { %v182_v55 = vpop.f32.mrf.mxu1 }
 0x17e   :  { %v183_v56 = vadd.f32 %v244_v54, %v182_v55 }
 0x17f   :  { %v179_v57 = vpop.f32.mrf.mxu0 }
 0x180   :  { %vm192_vm6 = vcmp.ge.f32.partialorder %v183_v56, 0.0  ;;  %v196_v58 = vmul.f32 0.2, %v183_v56  ;;  %v180_v59 = vadd.f32 %v244_v54, %v179_v57 }
 0x182   :  { %v200_v60 = vsel %vm192_vm6, %v183_v56, %v196_v58  ;;  %vm191_vm8 = vcmp.ge.f32.partialorder %v180_v59, 0.0  ;;  %v195_v61 = vmul.f32 0.2, %v180_v59 }
 0x183   :  { %205 = vst.msk [vmem:[%s389_s8 + $0x8] sm:$0xff] %vm203_vm7, %v200_v60 }
 0x184   :  { %v199_v62 = vsel %vm191_vm8, %v180_v59, %v195_v61 }
 0x185   :  { %204 = vst.msk [vmem:[%s389_s8] sm:$0xff] %vm203_vm7, %v199_v62 }
 0x18b   :  { %v185_v63 = vpop.f32.mrf.mxu2 }
 0x18c   :  { %v186_v0 = vadd.f32 %v244_v54, %v185_v63 }
 0x18e   :  { %vm193_vm9 = vcmp.ge.f32.partialorder %v186_v0, 0.0  ;;  %v197_v1 = vmul.f32 0.2, %v186_v0 }
 0x190   :  { %v201_v2 = vsel %vm193_vm9, %v186_v0, %v197_v1 }
 0x191   :  { %206 = vst.msk [vmem:[%s389_s8 + $0x10] sm:$0xff] %vm203_vm7, %v201_v2 }
 0x193   :  { %v188_v3 = vpop.f32.mrf.mxu2 }
 0x194   :  { %v189_v4 = vadd.f32 %v244_v54, %v188_v3 }
 0x196   :  { %vm194_vm10 = vcmp.ge.f32.partialorder %v189_v4, 0.0  ;;  %v198_v5 = vmul.f32 0.2, %v189_v4 }
 0x198   :  { %v202_v6 = vsel %vm194_vm10, %v189_v4, %v198_v5 }
 0x199   :  { %207 = vst.msk [vmem:[%s389_s8 + $0x18] sm:$0xff] %vm203_vm7, %v202_v6 }

// kernel: plsnet_forward.9
= control target key start
LH: loop header
LB: loop body
LE: loop exit
PB: predicated region body
PF: predicated region fallthrough
CT: control target
= control target key end

     0   :  { %s497_s0 = inlined_call_operand.vmem [shape: f32[2,88], index: 0, kind: input, shape index: {}]   ;;  %s498_s1 = inlined_call_operand.vmem [shape: f32[88,256], index: 1, kind: input, shape index: {}]   ;;  %s499_s2 = inlined_call_operand.vmem [shape: f32[1,256], index: 2, kind: input, shape index: {}]   ;;  %s500_s3 = inlined_call_operand.vmem [shape: f32[256,32], index: 3, kind: input, shape index: {}]   ;;  %s501_s4 = inlined_call_operand.vmem [shape: f32[1,32], index: 4, kind: input, shape index: {}]   ;;  %s502_s5 = inlined_call_operand.vmem [shape: f32[32,2], index: 5, kind: input, shape index: {}]   ;;  %s503_s6 = inlined_call_operand.vmem [shape: f32[1,2], index: 6, kind: input, shape index: {}]   ;;  %s504_s7 = inlined_call_operand.hbm [shape: f32[2,2], index: 7, kind: output, shape index: {}]  }
   0x1   :  { %v48_v0 = vld [vmem:[%s498_s1 + $0xa0] sm:$0xff]  ;;  %v49_v1 = vld [vmem:[%s498_s1 + $0xa8] sm:$0xff]  ;;  %v46_v2 = vld [vmem:[%s498_s1 + $0x90] sm:$0xff] }
   0x2   :  { %65 = vmatpush.msra.mxu0 %v48_v0  ;;  %85 = vmatpush.msra.mxu1 %v49_v1  ;;  %v47_v3 = vld [vmem:[%s498_s1 + $0x98] sm:$0xff]  ;;  %v44_v4 = vld [vmem:[%s498_s1 + $0x80] sm:$0xff]  ;;  %v45_v5 = vld [vmem:[%s498_s1 + $0x88] sm:$0xff] }
   0x3   :  { %v42_v6 = vld [vmem:[%s498_s1 + $0x70] sm:$0xff]  ;;  %v43_v7 = vld [vmem:[%s498_s1 + $0x78] sm:$0xff]  ;;  %v40_v8 = vld [vmem:[%s498_s1 + $0x60] sm:$0xff] }
   0x4   :  { %66 = vmatpush.msra.mxu0 %v46_v2  ;;  %86 = vmatpush.msra.mxu1 %v47_v3  ;;  %v41_v9 = vld [vmem:[%s498_s1 + $0x68] sm:$0xff]  ;;  %v38_v10 = vld [vmem:[%s498_s1 + $0x50] sm:$0xff]  ;;  %v121_v11 = vld [vmem:[%s500_s3 + $0x78] sm:$0xff] }
   0x5   :  { %v39_v12 = vld [vmem:[%s498_s1 + $0x58] sm:$0xff]  ;;  %142 = vmatpush.msra.mxu2 %v121_v11  ;;  %v120_v14 = vld [vmem:[%s500_s3 + $0x70] sm:$0xff]  ;;  %v119_v16 = vld [vmem:[%s500_s3 + $0x68] sm:$0xff] }
   0x6   :  { %67 = vmatpush.msra.mxu0 %v44_v4  ;;  %87 = vmatpush.msra.mxu1 %v45_v5  ;;  %v137_v13 = vld [vmem:[%s500_s3 + $0xf8] sm:$0xff]  ;;  %v136_v15 = vld [vmem:[%s500_s3 + $0xf0] sm:$0xff]  ;;  %v36_v17 = vld [vmem:[%s498_s1 + $0x40] sm:$0xff] }
   0x7   :  { %v37_v18 = vld [vmem:[%s498_s1 + $0x48] sm:$0xff]  ;;  %162 = vmatpush.msra.mxu3 %v137_v13  ;;  %143 = vmatpush.msra.mxu2 %v120_v14  ;;  %v118_v20 = vld [vmem:[%s500_s3 + $0x60] sm:$0xff]  ;;  %v34_v21 = vld [vmem:[%s498_s1 + $0x30] sm:$0xff] }
   0x8   :  { %68 = vmatpush.msra.mxu0 %v42_v6  ;;  %88 = vmatpush.msra.mxu1 %v43_v7  ;;  %v135_v19 = vld [vmem:[%s500_s3 + $0xe8] sm:$0xff]  ;;  %v35_v22 = vld [vmem:[%s498_s1 + $0x38] sm:$0xff]  ;;  %v134_v23 = vld [vmem:[%s500_s3 + $0xe0] sm:$0xff] }
   0x9   :  { %163 = vmatpush.msra.mxu3 %v136_v15  ;;  %144 = vmatpush.msra.mxu2 %v119_v16  ;;  %v117_v24 = vld [vmem:[%s500_s3 + $0x58] sm:$0xff]  ;;  %v32_v25 = vld [vmem:[%s498_s1 + $0x20] sm:$0xff]  ;;  %v33_v26 = vld [vmem:[%s498_s1 + $0x28] sm:$0xff] }
   0xa   :  { %69 = vmatpush.msra.mxu0 %v40_v8  ;;  %89 = vmatpush.msra.mxu1 %v41_v9  ;;  %v30_v27 = vld [vmem:[%s498_s1 + $0x10] sm:$0xff]  ;;  %v133_v28 = vld [vmem:[%s500_s3 + $0xd8] sm:$0xff]  ;;  %v115_v32 = vld [vmem:[%s500_s3 + $0x48] sm:$0xff] }
   0xb   :  { %164 = vmatpush.msra.mxu3 %v135_v19  ;;  %145 = vmatpush.msra.mxu2 %v118_v20  ;;  %v116_v29 = vld [vmem:[%s500_s3 + $0x50] sm:$0xff]  ;;  %v31_v30 = vld [vmem:[%s498_s1 + $0x18] sm:$0xff] }
   0xc   :  { %70 = vmatpush.msra.mxu0 %v38_v10  ;;  %90 = vmatpush.msra.mxu1 %v39_v12  ;;  %v132_v31 = vld [vmem:[%s500_s3 + $0xd0] sm:$0xff] }
   0xd   :  { %165 = vmatpush.msra.mxu3 %v134_v23  ;;  %146 = vmatpush.msra.mxu2 %v117_v24 }
   0xe   :  { %71 = vmatpush.msra.mxu0 %v36_v17  ;;  %91 = vmatpush.msra.mxu1 %v37_v18 }
  0x10   :  { %72 = vmatpush.msra.mxu0 %v34_v21  ;;  %92 = vmatpush.msra.mxu1 %v35_v22 }
  0x12   :  { %73 = vmatpush.msra.mxu0 %v32_v25  ;;  %93 = vmatpush.msra.mxu1 %v33_v26 }
  0x13   :  { %12 = vsyncpa [#allocation3], 0  ;;  %v28_v33 = vld [vmem:[%s498_s1] sm:$0xff]  ;;  %v29_v34 = vld [vmem:[%s498_s1 + $0x8] sm:$0xff]  ;;  %166 = vmatpush.msra.mxu3 %v133_v28  ;;  %147 = vmatpush.msra.mxu2 %v116_v29  ;;  %vm56_vm0 = vcmask 719872   ;;  %vm193_vm4 = vcmask 261120  }
  0x14   :  { %74 = vmatpush.msra.mxu0 %v30_v27  ;;  %94 = vmatpush.msra.mxu1 %v31_v30  ;;  %v27_v35 = vld [vmem:[%s497_s0] sm:$0x3]  ;;  %v131_v36 = vld [vmem:[%s500_s3 + $0xc8] sm:$0xff]  ;;  %v113_v39 = vld [vmem:[%s500_s3 + $0x38] sm:$0xff]  ;;  %s267_s27 = smov [#allocation2]   ;;  %s226_s30 = sshll.u32 %s504_s7, 4  ;;  %s227_s30 = int_to_ptr.hbm [resolvable:$true] %s226_s30 }
  0x15   :  { %167 = vmatpush.msra.mxu3 %v132_v31  ;;  %148 = vmatpush.msra.mxu2 %v115_v32  ;;  %v114_v37 = vld [vmem:[%s500_s3 + $0x40] sm:$0xff]  ;;  %v129_v40 = vld [vmem:[%s500_s3 + $0xb8] sm:$0xff]  ;;  %v112_v41 = vld [vmem:[%s500_s3 + $0x30] sm:$0xff]  ;;  %vm217_vm5 = vcmask 9216  }
  0x16   :  { %75 = vmatpush.msra.mxu0 %v28_v33  ;;  %95 = vmatpush.msra.mxu1 %v29_v34  ;;  %v130_v38 = vld [vmem:[%s500_s3 + $0xc0] sm:$0xff]  ;;  %v128_v42 = vld [vmem:[%s500_s3 + $0xb0] sm:$0xff]  ;;  %v111_v43 = vld [vmem:[%s500_s3 + $0x28] sm:$0xff] }
  0x17   :  { %235 = vmatmul.msk.f32.vlgmr.msra.gmra.mxu0 %vm56_vm0, %v27_v35  ;;  %236 = vmatmul.msk.f32.vlgmr.msra.gmra.mxu1 %vm56_vm0, %v27_v35  ;;  %v127_v44 = vld [vmem:[%s500_s3 + $0xa8] sm:$0xff]  ;;  %v110_v45 = vld [vmem:[%s500_s3 + $0x20] sm:$0xff]  ;;  %v109_v47 = vld [vmem:[%s500_s3 + $0x18] sm:$0xff] }
  0x18   :  { %168 = vmatpush.msra.mxu3 %v131_v36  ;;  %149 = vmatpush.msra.mxu2 %v114_v37  ;;  %v126_v46 = vld [vmem:[%s500_s3 + $0xa0] sm:$0xff]  ;;  %v125_v48 = vld [vmem:[%s500_s3 + $0x98] sm:$0xff]  ;;  %v108_v49 = vld [vmem:[%s500_s3 + $0x10] sm:$0xff] }
  0x19   :  { %v124_v50 = vld [vmem:[%s500_s3 + $0x90] sm:$0xff]  ;;  %v107_v51 = vld [vmem:[%s500_s3 + $0x8] sm:$0xff]  ;;  %v106_v53 = vld [vmem:[%s500_s3] sm:$0xff] }
  0x1a   :  { %169 = vmatpush.msra.mxu3 %v130_v38  ;;  %150 = vmatpush.msra.mxu2 %v113_v39  ;;  %v123_v52 = vld [vmem:[%s500_s3 + $0x88] sm:$0xff]  ;;  %v122_v54 = vld [vmem:[%s500_s3 + $0x80] sm:$0xff]  ;;  %v188_v2 = vld [vmem:[%s502_s5 + $0x18] sm:$0xff] }
  0x1b   :  { %v50_v55 = vld [vmem:[%s499_s2] sm:$0x3]  ;;  %209 = vmatpush.msrb.mxu0 %v188_v2  ;;  %v187_v3 = vld [vmem:[%s502_s5 + $0x10] sm:$0xff]  ;;  %v186_v4 = vld [vmem:[%s502_s5 + $0x8] sm:$0xff] }
  0x1c   :  { %170 = vmatpush.msra.mxu3 %v129_v40  ;;  %151 = vmatpush.msra.mxu2 %v112_v41  ;;  %v52_v56 = vperm.slane %v50_v55, 0  ;;  %v53_v57 = vperm.slane %v50_v55, 1  ;;  %v185_v5 = vld [vmem:[%s502_s5] sm:$0xff]  ;;  %s224_s5 = sshll.u32 %s267_s27, 4  ;;  %s225_s5 = int_to_ptr.vmem [resolvable:$true] %s224_s5 }
  0x1d   :  { %210 = vmatpush.msrb.mxu0 %v187_v3  ;;  %v239_v6 = vld [vmem:[%s501_s4] ss:$0 sm:$0xff] }
  0x1e   :  { %171 = vmatpush.msra.mxu3 %v128_v42  ;;  %152 = vmatpush.msra.mxu2 %v111_v43  ;;  %v240_v13 = vld [vmem:[%s503_s6] ss:$0 sm:$0xff] }
  0x1f   :  { %211 = vmatpush.msrb.mxu0 %v186_v4 }
  0x20   :  { %172 = vmatpush.msra.mxu3 %v127_v44  ;;  %153 = vmatpush.msra.mxu2 %v110_v45 }
  0x21   :  { %212 = vmatpush.msrb.mxu0 %v185_v5 }
  0x22   :  { %173 = vmatpush.msra.mxu3 %v126_v46  ;;  %154 = vmatpush.msra.mxu2 %v109_v47 }
  0x24   :  { %174 = vmatpush.msra.mxu3 %v125_v48  ;;  %155 = vmatpush.msra.mxu2 %v108_v49 }
  0x26   :  { %175 = vmatpush.msra.mxu3 %v124_v50  ;;  %156 = vmatpush.msra.mxu2 %v107_v51 }
  0x28   :  { %176 = vmatpush.msra.mxu3 %v123_v52  ;;  %157 = vmatpush.msra.mxu2 %v106_v53 }
  0x2a   :  { %177 = vmatpush.msra.mxu3 %v122_v54 }
  0x94   :  { %v77_v58 = vpop.f32.mrf.mxu0  ;;  %v97_v59 = vpop.f32.mrf.mxu1 }
  0x95   :  { %v78_v60 = vadd.f32 %v77_v58, %v52_v56  ;;  %v98_v61 = vadd.f32 %v97_v59, %v53_v57 }
  0x97   :  { %vm100_vm1 = vcmp.ge.f32.partialorder %v78_v60, 0.0  ;;  %v102_v62 = vmul.f32 0.2, %v78_v60  ;;  %vm101_vm2 = vcmp.ge.f32.partialorder %v98_v61, 0.0  ;;  %v103_v63 = vmul.f32 0.2, %v98_v61 }
  0x99   :  { %v104_v0 = vsel %vm100_vm1, %v78_v60, %v102_v62  ;;  %v105_v1 = vsel %vm101_vm2, %v98_v61, %v103_v63 }
  0x9a   :  { %158 = vmatmul.f32.vlgmr.msra.gmra.mxu2 %v104_v0  ;;  %178 = vmatmul.f32.vlgmr.msra.gmra.mxu3 %v105_v1 }
 0x11d   :  { %v159_v7 = vpop.f32.mrf.mxu2  ;;  %v179_v9 = vpop.f32.mrf.mxu3 }
 0x11e   :  { %v160_v8 = vadd.f32 %v239_v6, %v159_v7 }
 0x120   :  { %v180_v10 = vadd.f32 %v179_v9, %v160_v8 }
 0x122   :  { %vm182_vm3 = vcmp.ge.f32.partialorder %v180_v10, 0.0  ;;  %v183_v11 = vmul.f32 0.2, %v180_v10 }
 0x124   :  { %v184_v12 = vsel %vm182_vm3, %v180_v10, %v183_v11 }
 0x125   :  { %237 = vmatmul.msk.f32.vlgmr.msrb.gmra.mxu0 %vm193_vm4, %v184_v12 }
 0x1a2   :  { %v214_v14 = vpop.f32.mrf.mxu0 }
 0x1a3   :  { %v215_v15 = vadd.f32 %v240_v13, %v214_v14 }
 0x1a5   :  { %218 = vst.msk [vmem:[#allocation2] sm:$0x3] %vm217_vm5, %v215_v15 }
 0x1a6   :  { %229 = dma.vmem_to_hbm [thread:$0]  %s225_s5, 32, %s227_s30, [#allocation3]  }
 0x1a7   :  { %265 = dma.done.wait [#allocation3], 32  }
 0x1a8   :  { %266 = vsyncadd [#allocation3], 4294967264 }
 0x1a9   :  { %234 = vsyncpa [#allocation3], 1 }

</bundles_post_ra>
